<compile_context>
chip_gen: v5e
topology: v5e:2x2
jax: 0.10.0
libtpu: 0.0.40
codegen_flags: <defaults>
</compile_context>

<pallas_src>
import math

import jax
import jax.numpy as jnp
import numpy as np
from jax.experimental import pallas as pl
from jax.experimental.pallas import tpu as pltpu

NEG = -1e30  # additive mask value (exp underflows to 0 after max subtraction)


# ----------------------------- config -----------------------------
class Config:
    n_embd = 32
    n_head = 4
    block_size = 64      # sequence length n (== T here)
    m = 8                # fine window
    p = 2                # summaries per coarse window
    dropout = 0.0
    bias = True
    scale_attn = True
    downsampling = "groupedconv"


def _levels(cfg):
    return int(math.log2(cfg.block_size // cfg.m)) - 1


# ----------------------------- bias table (kernel input) -----------------------------
def build_bias_table(T, m, p, L, scale_attn):
    """(T, Ktot) additive score bias: causal fine band, coarse interaction-list
    mask and log of the per-level scale_attn weights folded into one constant.
    Coarse columns are ordered q-major within each level (all q=0 groups, then
    all q=1 groups, ...) to match the kernel's panel layout."""
    i = np.arange(T)[:, None]
    c = i // m
    j = np.arange(T)[None, :]
    parts = [np.where((j >= (c - 1) * m) & (j <= i), 0.0, NEG)]
    for l in range(1, L + 1):
        wl = m * 2 ** (l - 1)
        G = T // wl
        cl = i // wl
        g = np.tile(np.arange(G), p)[None, :]                  # q-major ordering
        ok = (g >= 2 * (cl // 2) - 2) & (g <= cl - 2)
        lw = math.log(float((m * 2 ** (l - 1)) // p)) if scale_attn else 0.0
        parts.append(np.where(ok, lw, NEG))
    return np.concatenate(parts, axis=1).astype(np.float32)


# ----------------------------- fused forward kernel -----------------------------
def make_fused_kernel(*, T, C, H, d, m, p, L):
    bf16 = jnp.bfloat16
    C2 = 2 * C

    def kernel(x_ref, wqkv_ref, bqkv_ref, wproj_ref, bproj_ref, bias_ref,
               wkv_ref, bkv_ref, o_ref):
        # ---- c_attn (fused QKV projection; bf16 MXU, f32 accumulate).
        #      1/sqrt(d) is pre-folded into the Q columns of wqkv / bqkv. ----
        x = x_ref[0].astype(bf16)                               # (T, C)
        qkv = (jnp.dot(x, wqkv_ref[...], preferred_element_type=jnp.float32)
               + bqkv_ref[...])                                 # (T, 3C) f32
        q = qkv[:, :C]                                          # (T, C)  pre-scaled
        kv = qkv[:, C:]                                         # (T, 2C) = [K | V]

        # ---- grouped-conv downsampling, K and V fused on the (T, 2C) slab.
        #      Panel rows: [T fine rows] + per level [G rows q=0, G rows q=1]. ----
        wkv = wkv_ref[...]                                      # (p, sum_w, 2C) f32
        bkv = bkv_ref[...]                                      # (L, p, 2C)     f32
        panel_parts = [kv]
        off = 0
        for l in range(L):
            wlen = m * (2 ** l)
            G = T // wlen
            w_l = wkv[:, off:off + wlen, :]                     # (p, wlen, 2C)
            off += wlen
            kvb = kv.reshape(G, wlen, C2)
            for qq in range(p):
                panel_parts.append(
                    jnp.sum(kvb * w_l[qq][None, :, :], axis=1)
                    + bkv[l, qq][None, :])                      # (G, 2C)
        kv_panel = jnp.concatenate(panel_parts, axis=0).astype(bf16)  # (Ktot, 2C)
        q_b = q.astype(bf16)
        bias = bias_ref[...]                                    # (T, Ktot) f32

        # ---- dense masked multi-level attention: 2 matmuls + 1 softmax per head ----
        head_outs = []
        for h in range(H):
            ks = slice(h * d, (h + 1) * d)                      # K lanes of this head
            vs = slice(C + h * d, C + (h + 1) * d)              # V lanes of this head
            s = jax.lax.dot_general(q_b[:, ks], kv_panel[:, ks],
                                    (((1,), (1,)), ((), ())),
                                    preferred_element_type=jnp.float32)  # (T, Ktot)
            s = s + bias                                        # mask + log scales
            mx = jnp.max(s, axis=-1, keepdims=True)
            e = jnp.exp(s - mx)
            denom = jnp.sum(e, axis=-1, keepdims=True)
            o = jnp.dot(e.astype(bf16), kv_panel[:, vs],
                        preferred_element_type=jnp.float32)     # (T, d)
            head_outs.append(o * pl.reciprocal(denom, approx=True))
        attn = jnp.concatenate(head_outs, axis=1)               # (T, C) f32

        # ---- c_proj ----
        y = (jnp.dot(attn.astype(bf16), wproj_ref[...],
                     preferred_element_type=jnp.float32) + bproj_ref[...])
        o_ref[0] = y.astype(o_ref.dtype)

    return kernel


# ----------------------------- parameter prep (one-time) -----------------------------
def prepare_kernel_params(params, cfg):
    """One-time transform of module parameters into kernel-ready inputs: bf16
    weights, 1/sqrt(d) folded into the Q projection, per-head grouped-conv
    weights tiled to the (T, C) channel layout with K/V fused along channels
    and all levels packed into two arrays, plus the precomputed bias table."""
    C, H = cfg.n_embd, cfg.n_head
    d = C // H
    m, p, T = cfg.m, cfg.p, cfg.block_size
    L = _levels(cfg)

    qscale = jnp.concatenate([jnp.full((C,), 1.0 / math.sqrt(d), jnp.float32),
                              jnp.ones((2 * C,), jnp.float32)])
    w_attn = (params["w_attn"] * qscale[None, :]).astype(jnp.bfloat16)
    b_attn = (params["b_attn"] * qscale).reshape(1, 3 * C).astype(jnp.float32)
    w_proj = params["w_proj"].astype(jnp.bfloat16)
    b_proj = params["b_proj"].reshape(1, C).astype(jnp.float32)

    wkv_parts, bkv_parts = [], []
    for l in range(L):
        wk, bk = params["conv_k"][l]
        wv, bv = params["conv_v"][l]
        wkv_parts.append(jnp.concatenate(
            [jnp.tile(wk, (1, 1, H)), jnp.tile(wv, (1, 1, H))], axis=-1))  # (p, w_l, 2C)
        bkv_parts.append(jnp.concatenate(
            [jnp.tile(bk, (1, H)), jnp.tile(bv, (1, H))], axis=-1))        # (p, 2C)
    w_kv = jnp.concatenate(wkv_parts, axis=1)        # (p, sum_w, 2C)
    b_kv = jnp.stack(bkv_parts, axis=0)              # (L, p, 2C)

    bias = jnp.asarray(build_bias_table(T, m, p, L, cfg.scale_attn))
    return dict(w_attn=w_attn, b_attn=b_attn, w_proj=w_proj, b_proj=b_proj,
                w_kv=w_kv, b_kv=b_kv, bias=bias)


# ----------------------------- wrapper -----------------------------
def causal_self_mha_forward(kparams, x, cfg):
    B, T, C = x.shape
    H = cfg.n_head
    d = C // H
    m, p = cfg.m, cfg.p
    L = _levels(cfg)
    sum_w = sum(m * 2 ** l for l in range(L))
    Ktot = T + sum((T // (m * 2 ** l)) * p for l in range(L))

    kernel = make_fused_kernel(T=T, C=C, H=H, d=d, m=m, p=p, L=L)

    in_specs = [
        pl.BlockSpec((1, T, C), lambda b: (b, 0, 0)),            # x
        pl.BlockSpec((C, 3 * C), lambda b: (0, 0)),              # w_attn (bf16, q-scaled)
        pl.BlockSpec((1, 3 * C), lambda b: (0, 0)),              # b_attn
        pl.BlockSpec((C, C), lambda b: (0, 0)),                  # w_proj (bf16)
        pl.BlockSpec((1, C), lambda b: (0, 0)),                  # b_proj
        pl.BlockSpec((T, Ktot), lambda b: (0, 0)),               # additive bias table
        pl.BlockSpec((p, sum_w, 2 * C), lambda b: (0, 0, 0)),    # fused conv weights
        pl.BlockSpec((L, p, 2 * C), lambda b: (0, 0, 0)),        # fused conv biases
    ]

    return pl.pallas_call(
        kernel,
        grid=(B,),
        in_specs=in_specs,
        out_specs=pl.BlockSpec((1, T, C), lambda b: (b, 0, 0)),
        out_shape=jax.ShapeDtypeStruct((B, T, C), x.dtype),
        compiler_params=pltpu.CompilerParams(
            # v7x: shard the batch grid over both TensorCores (B >= 2).  On
            # single-TC v5e/v6e the extra grid step at B=2 costs ~0.35us.
            dimension_semantics=("parallel",),
            vmem_limit_bytes=32 * 1024 * 1024),
    )(x, kparams["w_attn"], kparams["b_attn"], kparams["w_proj"],
      kparams["b_proj"], kparams["bias"], kparams["w_kv"], kparams["b_kv"])


# ----------------------------- parameters -----------------------------
def init_params(key, cfg):
    d = cfg.n_embd // cfg.n_head
    L = _levels(cfg)
    keys = jax.random.split(key, 4 + 4 * L)
    params = {
        "w_attn": 0.02 * jax.random.normal(keys[0], (cfg.n_embd, 3 * cfg.n_embd), jnp.float32),
        "b_attn": 0.02 * jax.random.normal(keys[1], (3 * cfg.n_embd,), jnp.float32),
        "w_proj": 0.02 * jax.random.normal(keys[2], (cfg.n_embd, cfg.n_embd), jnp.float32),
        "b_proj": 0.02 * jax.random.normal(keys[3], (cfg.n_embd,), jnp.float32),
        "conv_k": [], "conv_v": [],
    }
    ki = 4
    for l in range(L):
        w = cfg.m * 2 ** l
        # grouped Conv1d(d, p*d, w, stride=w, groups=d): torch weight (p*d, 1, w) stored as (p, w, d)
        wk = (1.0 / w) + 0.02 * jax.random.normal(keys[ki], (cfg.p, w, d), jnp.float32); ki += 1
        bk = 0.02 * jax.random.normal(keys[ki], (cfg.p, d), jnp.float32); ki += 1
        wv = (1.0 / w) + 0.02 * jax.random.normal(keys[ki], (cfg.p, w, d), jnp.float32); ki += 1
        bv = 0.02 * jax.random.normal(keys[ki], (cfg.p, d), jnp.float32); ki += 1
        params["conv_k"].append((wk, bk))
        params["conv_v"].append((wv, bv))
    return params


# ----------------------------- pure-JAX f32 reference (no Pallas) -----------------------------
def reference_forward(params, x, cfg):
    B, T, C = x.shape
    H, m, p = cfg.n_head, cfg.m, cfg.p
    d = C // H
    L = _levels(cfg)

    qkv = (x.reshape(B * T, C) @ params["w_attn"] + params["b_attn"]).reshape(B, T, 3 * C)
    q, k, v = jnp.split(qkv, 3, axis=2)

    def to_heads(t):
        return t.reshape(B, T, H, d).transpose(0, 2, 1, 3).reshape(B * H, T, d)

    q, k, v = to_heads(q), to_heads(k), to_heads(v)
    q = q / math.sqrt(d)

    kls, vls = [k], [v]
    for l in range(L):
        w = m * 2 ** l
        wk, bk = params["conv_k"][l]
        wv, bv = params["conv_v"][l]
        kb = k.reshape(B * H, T // w, w, d)
        vb = v.reshape(B * H, T // w, w, d)
        kls.append((jnp.einsum("bgtd,qtd->bgqd", kb, wk) + bk[None, None]).reshape(B * H, (T // w) * p, d))
        vls.append((jnp.einsum("bgtd,qtd->bgqd", vb, wv) + bv[None, None]).reshape(B * H, (T // w) * p, d))

    n = T
    i = jnp.arange(n)[:, None]
    c = i // m
    j = jnp.arange(n)[None, :]
    s0 = jnp.einsum("bid,bjd->bij", q, k)
    scores = [jnp.where(((j >= (c - 1) * m) & (j <= i))[None], s0, NEG)]
    for l in range(1, L + 1):
        wl = m * 2 ** (l - 1)
        kl = kls[l]
        sl = jnp.einsum("bid,bjd->bij", q, kl)
        cl = i // wl
        g = (jnp.arange(kl.shape[1]) // p)[None, :]
        maskl = (g >= 2 * (cl // 2) - 2) & (g <= cl - 2)
        scores.append(jnp.where(maskl[None], sl, NEG))

    gmax = jnp.max(jnp.concatenate([s.max(-1, keepdims=True) for s in scores], -1), -1, keepdims=True)
    exps = [jnp.exp(s - gmax) for s in scores]
    denom = exps[0].sum(-1, keepdims=True)
    out = jnp.einsum("bij,bjd->bid", exps[0], vls[0])
    for l in range(1, L + 1):
        scale = float((m * 2 ** (l - 1)) // p) if cfg.scale_attn else 1.0
        denom = denom + scale * exps[l].sum(-1, keepdims=True)
        out = out + scale * jnp.einsum("bij,bjd->bid", exps[l], vls[l])
    out = out / denom

    y = out.reshape(B, H, T, d).transpose(0, 2, 1, 3).reshape(B, T, C)
    y = (y.reshape(B * T, C) @ params["w_proj"] + params["b_proj"]).reshape(B, T, C)
    return y


# ----------------------------- main -----------------------------
if __name__ == "__main__":
    cfg = Config()
    key = jax.random.PRNGKey(0)
    pkey, xkey = jax.random.split(key)
    params = init_params(pkey, cfg)
    kparams = prepare_kernel_params(params, cfg)     # one-time transform

    B, T, C = 2, cfg.block_size, cfg.n_embd
    x = jax.random.normal(xkey, (B, T, C), jnp.float32)

    y = jax.block_until_ready(causal_self_mha_forward(kparams, x, cfg))
    y_ref = reference_forward(params, x, cfg)

    assert y.shape == (B, T, C)
    assert bool(jnp.all(jnp.isfinite(y)))
    # Kernel feeds the MXU bf16 (f32 accumulation) -> small deviation vs the f32 reference.
    max_err = float(jnp.max(jnp.abs(y - y_ref)))
    assert max_err < 2e-3, f"mismatch vs pure-JAX reference: {max_err}"

    print("KERNEL_OK")
</pallas_src>

<mosaic_0001>
module attributes {stable_mosaic.version = 11 : i64} {
  func.func @kernel(%arg0: i32, %arg1: memref<1x64x32xf32, #tpu.memory_space<vmem>>, %arg2: memref<32x96xbf16, #tpu.memory_space<vmem>>, %arg3: memref<1x96xf32, #tpu.memory_space<vmem>>, %arg4: memref<32x32xbf16, #tpu.memory_space<vmem>>, %arg5: memref<1x32xf32, #tpu.memory_space<vmem>>, %arg6: memref<64x88xf32, #tpu.memory_space<vmem>>, %arg7: memref<2x24x64xf32, #tpu.memory_space<vmem>>, %arg8: memref<2x2x64xf32, #tpu.memory_space<vmem>>, %arg9: memref<1x64x32xf32, #tpu.memory_space<vmem>>) attributes {dimension_semantics = [#tpu.dimension_semantics<parallel>], iteration_bounds = array<i64: 2>, scalar_prefetch = 0 : i64, scratch_operands = 0 : i64, tpu.core_type = #tpu.core_type<tc>, window_params = [{transform_indices = @transform_0, window_bounds = array<i64: 1, 64, 32>}, {pipeline_mode = #tpu.pipeline_mode<synchronous>, transform_indices = @transform_1, window_bounds = array<i64: 32, 96>}, {pipeline_mode = #tpu.pipeline_mode<synchronous>, transform_indices = @transform_2, window_bounds = array<i64: 1, 96>}, {pipeline_mode = #tpu.pipeline_mode<synchronous>, transform_indices = @transform_3, window_bounds = array<i64: 32, 32>}, {pipeline_mode = #tpu.pipeline_mode<synchronous>, transform_indices = @transform_4, window_bounds = array<i64: 1, 32>}, {pipeline_mode = #tpu.pipeline_mode<synchronous>, transform_indices = @transform_5, window_bounds = array<i64: 64, 88>}, {pipeline_mode = #tpu.pipeline_mode<synchronous>, transform_indices = @transform_6, window_bounds = array<i64: 2, 24, 64>}, {pipeline_mode = #tpu.pipeline_mode<synchronous>, transform_indices = @transform_7, window_bounds = array<i64: 2, 2, 64>}, {transform_indices = @transform_8, window_bounds = array<i64: 1, 64, 32>}]} {
    %c0 = arith.constant 0 : index
    %c0_0 = arith.constant 0 : index
    %c0_1 = arith.constant 0 : index
    %0 = vector.load %arg1[%c0, %c0_0, %c0_1] : memref<1x64x32xf32, #tpu.memory_space<vmem>>, vector<1x64x32xf32>
    %1 = vector.shape_cast %0 : vector<1x64x32xf32> to vector<64x32xf32>
    %2 = arith.truncf %1 : vector<64x32xf32> to vector<64x32xbf16>
    %c0_2 = arith.constant 0 : index
    %c0_3 = arith.constant 0 : index
    %3 = vector.load %arg2[%c0_2, %c0_3] : memref<32x96xbf16, #tpu.memory_space<vmem>>, vector<32x96xbf16>
    %cst = arith.constant dense<0.000000e+00> : vector<64x96xf32>
    %4 = tpu.matmul %2, %3, %cst {dimension_numbers = #tpu.dot_dimension_numbers<[1], [0], [0], [1], [0, 0, 1, 1], [], []>} : vector<64x32xbf16>, vector<32x96xbf16>, vector<64x96xf32> -> vector<64x96xf32>
    %c0_4 = arith.constant 0 : index
    %c0_5 = arith.constant 0 : index
    %5 = vector.load %arg3[%c0_4, %c0_5] : memref<1x96xf32, #tpu.memory_space<vmem>>, vector<1x96xf32>
    %6 = vector.broadcast %5 : vector<1x96xf32> to vector<64x96xf32>
    %7 = arith.addf %4, %6 : vector<64x96xf32>
    %8 = vector.extract_strided_slice %7 {offsets = [0, 0], sizes = [64, 32], strides = [1, 1]} : vector<64x96xf32> to vector<64x32xf32>
    %9 = vector.extract_strided_slice %7 {offsets = [0, 32], sizes = [64, 64], strides = [1, 1]} : vector<64x96xf32> to vector<64x64xf32>
    %c0_6 = arith.constant 0 : index
    %c0_7 = arith.constant 0 : index
    %c0_8 = arith.constant 0 : index
    %10 = vector.load %arg7[%c0_6, %c0_7, %c0_8] : memref<2x24x64xf32, #tpu.memory_space<vmem>>, vector<2x24x64xf32>
    %c0_9 = arith.constant 0 : index
    %c0_10 = arith.constant 0 : index
    %c0_11 = arith.constant 0 : index
    %11 = vector.load %arg8[%c0_9, %c0_10, %c0_11] : memref<2x2x64xf32, #tpu.memory_space<vmem>>, vector<2x2x64xf32>
    %12 = vector.extract_strided_slice %10 {offsets = [0, 0, 0], sizes = [2, 8, 64], strides = [1, 1, 1]} : vector<2x24x64xf32> to vector<2x8x64xf32>
    %13 = vector.shape_cast %9 : vector<64x64xf32> to vector<8x8x64xf32>
    %14 = vector.extract_strided_slice %12 {offsets = [0, 0, 0], sizes = [1, 8, 64], strides = [1, 1, 1]} : vector<2x8x64xf32> to vector<1x8x64xf32>
    %15 = vector.shape_cast %14 : vector<1x8x64xf32> to vector<8x64xf32>
    %16 = vector.shape_cast %15 : vector<8x64xf32> to vector<1x8x64xf32>
    %17 = vector.broadcast %16 : vector<1x8x64xf32> to vector<8x8x64xf32>
    %18 = arith.mulf %13, %17 : vector<8x8x64xf32>
    %cst_12 = arith.constant dense<0.000000e+00> : vector<8x64xf32>
    %19 = vector.multi_reduction <add>, %18, %cst_12 [1] : vector<8x8x64xf32> to vector<8x64xf32>
    %20 = vector.extract_strided_slice %11 {offsets = [0, 0, 0], sizes = [1, 1, 64], strides = [1, 1, 1]} : vector<2x2x64xf32> to vector<1x1x64xf32>
    %21 = vector.shape_cast %20 : vector<1x1x64xf32> to vector<64xf32>
    %22 = vector.shape_cast %21 : vector<64xf32> to vector<1x64xf32>
    %23 = vector.broadcast %22 : vector<1x64xf32> to vector<8x64xf32>
    %24 = arith.addf %19, %23 : vector<8x64xf32>
    %25 = vector.extract_strided_slice %12 {offsets = [1, 0, 0], sizes = [1, 8, 64], strides = [1, 1, 1]} : vector<2x8x64xf32> to vector<1x8x64xf32>
    %26 = vector.shape_cast %25 : vector<1x8x64xf32> to vector<8x64xf32>
    %27 = vector.shape_cast %26 : vector<8x64xf32> to vector<1x8x64xf32>
    %28 = vector.broadcast %27 : vector<1x8x64xf32> to vector<8x8x64xf32>
    %29 = arith.mulf %13, %28 : vector<8x8x64xf32>
    %cst_13 = arith.constant dense<0.000000e+00> : vector<8x64xf32>
    %30 = vector.multi_reduction <add>, %29, %cst_13 [1] : vector<8x8x64xf32> to vector<8x64xf32>
    %31 = vector.extract_strided_slice %11 {offsets = [0, 1, 0], sizes = [1, 1, 64], strides = [1, 1, 1]} : vector<2x2x64xf32> to vector<1x1x64xf32>
    %32 = vector.shape_cast %31 : vector<1x1x64xf32> to vector<64xf32>
    %33 = vector.shape_cast %32 : vector<64xf32> to vector<1x64xf32>
    %34 = vector.broadcast %33 : vector<1x64xf32> to vector<8x64xf32>
    %35 = arith.addf %30, %34 : vector<8x64xf32>
    %36 = vector.extract_strided_slice %10 {offsets = [0, 8, 0], sizes = [2, 16, 64], strides = [1, 1, 1]} : vector<2x24x64xf32> to vector<2x16x64xf32>
    %37 = vector.shape_cast %9 : vector<64x64xf32> to vector<4x16x64xf32>
    %38 = vector.extract_strided_slice %36 {offsets = [0, 0, 0], sizes = [1, 16, 64], strides = [1, 1, 1]} : vector<2x16x64xf32> to vector<1x16x64xf32>
    %39 = vector.shape_cast %38 : vector<1x16x64xf32> to vector<16x64xf32>
    %40 = vector.shape_cast %39 : vector<16x64xf32> to vector<1x16x64xf32>
    %41 = vector.broadcast %40 : vector<1x16x64xf32> to vector<4x16x64xf32>
    %42 = arith.mulf %37, %41 : vector<4x16x64xf32>
    %cst_14 = arith.constant dense<0.000000e+00> : vector<4x64xf32>
    %43 = vector.multi_reduction <add>, %42, %cst_14 [1] : vector<4x16x64xf32> to vector<4x64xf32>
    %44 = vector.extract_strided_slice %11 {offsets = [1, 0, 0], sizes = [1, 1, 64], strides = [1, 1, 1]} : vector<2x2x64xf32> to vector<1x1x64xf32>
    %45 = vector.shape_cast %44 : vector<1x1x64xf32> to vector<64xf32>
    %46 = vector.shape_cast %45 : vector<64xf32> to vector<1x64xf32>
    %47 = vector.broadcast %46 : vector<1x64xf32> to vector<4x64xf32>
    %48 = arith.addf %43, %47 : vector<4x64xf32>
    %49 = vector.extract_strided_slice %36 {offsets = [1, 0, 0], sizes = [1, 16, 64], strides = [1, 1, 1]} : vector<2x16x64xf32> to vector<1x16x64xf32>
    %50 = vector.shape_cast %49 : vector<1x16x64xf32> to vector<16x64xf32>
    %51 = vector.shape_cast %50 : vector<16x64xf32> to vector<1x16x64xf32>
    %52 = vector.broadcast %51 : vector<1x16x64xf32> to vector<4x16x64xf32>
    %53 = arith.mulf %37, %52 : vector<4x16x64xf32>
    %cst_15 = arith.constant dense<0.000000e+00> : vector<4x64xf32>
    %54 = vector.multi_reduction <add>, %53, %cst_15 [1] : vector<4x16x64xf32> to vector<4x64xf32>
    %55 = vector.extract_strided_slice %11 {offsets = [1, 1, 0], sizes = [1, 1, 64], strides = [1, 1, 1]} : vector<2x2x64xf32> to vector<1x1x64xf32>
    %56 = vector.shape_cast %55 : vector<1x1x64xf32> to vector<64xf32>
    %57 = vector.shape_cast %56 : vector<64xf32> to vector<1x64xf32>
    %58 = vector.broadcast %57 : vector<1x64xf32> to vector<4x64xf32>
    %59 = arith.addf %54, %58 : vector<4x64xf32>
    %60 = tpu.concatenate %9, %24, %35, %48, %59 in 0 : vector<64x64xf32>, vector<8x64xf32>, vector<8x64xf32>, vector<4x64xf32>, vector<4x64xf32> -> vector<88x64xf32>
    %61 = arith.truncf %60 : vector<88x64xf32> to vector<88x64xbf16>
    %62 = arith.truncf %8 : vector<64x32xf32> to vector<64x32xbf16>
    %c0_16 = arith.constant 0 : index
    %c0_17 = arith.constant 0 : index
    %63 = vector.load %arg6[%c0_16, %c0_17] : memref<64x88xf32, #tpu.memory_space<vmem>>, vector<64x88xf32>
    %64 = vector.extract_strided_slice %62 {offsets = [0, 0], sizes = [64, 8], strides = [1, 1]} : vector<64x32xbf16> to vector<64x8xbf16>
    %65 = vector.extract_strided_slice %61 {offsets = [0, 0], sizes = [88, 8], strides = [1, 1]} : vector<88x64xbf16> to vector<88x8xbf16>
    %cst_18 = arith.constant dense<0.000000e+00> : vector<64x88xf32>
    %66 = tpu.matmul %64, %65, %cst_18 {dimension_numbers = #tpu.dot_dimension_numbers<[1], [1], [0], [0], [0, 0, 1, 0], [], []>} : vector<64x8xbf16>, vector<88x8xbf16>, vector<64x88xf32> -> vector<64x88xf32>
    %67 = arith.addf %66, %63 : vector<64x88xf32>
    %cst_19 = arith.constant dense<0xFF800000> : vector<64xf32>
    %68 = vector.multi_reduction <maximumf>, %67, %cst_19 [1] : vector<64x88xf32> to vector<64xf32>
    %69 = vector.shape_cast %68 : vector<64xf32> to vector<64x1xf32>
    %70 = vector.broadcast %69 : vector<64x1xf32> to vector<64x88xf32>
    %71 = arith.subf %67, %70 : vector<64x88xf32>
    %72 = math.exp %71 : vector<64x88xf32>
    %cst_20 = arith.constant dense<0.000000e+00> : vector<64xf32>
    %73 = vector.multi_reduction <add>, %72, %cst_20 [1] : vector<64x88xf32> to vector<64xf32>
    %74 = vector.shape_cast %73 : vector<64xf32> to vector<64x1xf32>
    %75 = arith.truncf %72 : vector<64x88xf32> to vector<64x88xbf16>
    %76 = vector.extract_strided_slice %61 {offsets = [0, 32], sizes = [88, 8], strides = [1, 1]} : vector<88x64xbf16> to vector<88x8xbf16>
    %cst_21 = arith.constant dense<0.000000e+00> : vector<64x8xf32>
    %77 = tpu.matmul %75, %76, %cst_21 {dimension_numbers = #tpu.dot_dimension_numbers<[1], [0], [0], [1], [0, 0, 1, 1], [], []>} : vector<64x88xbf16>, vector<88x8xbf16>, vector<64x8xf32> -> vector<64x8xf32>
    %78 = tpu.reciprocal %74 {approx = true} : vector<64x1xf32> -> vector<64x1xf32>
    %79 = vector.broadcast %78 : vector<64x1xf32> to vector<64x8xf32>
    %80 = arith.mulf %77, %79 : vector<64x8xf32>
    %81 = vector.extract_strided_slice %62 {offsets = [0, 8], sizes = [64, 8], strides = [1, 1]} : vector<64x32xbf16> to vector<64x8xbf16>
    %82 = vector.extract_strided_slice %61 {offsets = [0, 8], sizes = [88, 8], strides = [1, 1]} : vector<88x64xbf16> to vector<88x8xbf16>
    %cst_22 = arith.constant dense<0.000000e+00> : vector<64x88xf32>
    %83 = tpu.matmul %81, %82, %cst_22 {dimension_numbers = #tpu.dot_dimension_numbers<[1], [1], [0], [0], [0, 0, 1, 0], [], []>} : vector<64x8xbf16>, vector<88x8xbf16>, vector<64x88xf32> -> vector<64x88xf32>
    %84 = arith.addf %83, %63 : vector<64x88xf32>
    %cst_23 = arith.constant dense<0xFF800000> : vector<64xf32>
    %85 = vector.multi_reduction <maximumf>, %84, %cst_23 [1] : vector<64x88xf32> to vector<64xf32>
    %86 = vector.shape_cast %85 : vector<64xf32> to vector<64x1xf32>
    %87 = vector.broadcast %86 : vector<64x1xf32> to vector<64x88xf32>
    %88 = arith.subf %84, %87 : vector<64x88xf32>
    %89 = math.exp %88 : vector<64x88xf32>
    %cst_24 = arith.constant dense<0.000000e+00> : vector<64xf32>
    %90 = vector.multi_reduction <add>, %89, %cst_24 [1] : vector<64x88xf32> to vector<64xf32>
    %91 = vector.shape_cast %90 : vector<64xf32> to vector<64x1xf32>
    %92 = arith.truncf %89 : vector<64x88xf32> to vector<64x88xbf16>
    %93 = vector.extract_strided_slice %61 {offsets = [0, 40], sizes = [88, 8], strides = [1, 1]} : vector<88x64xbf16> to vector<88x8xbf16>
    %cst_25 = arith.constant dense<0.000000e+00> : vector<64x8xf32>
    %94 = tpu.matmul %92, %93, %cst_25 {dimension_numbers = #tpu.dot_dimension_numbers<[1], [0], [0], [1], [0, 0, 1, 1], [], []>} : vector<64x88xbf16>, vector<88x8xbf16>, vector<64x8xf32> -> vector<64x8xf32>
    %95 = tpu.reciprocal %91 {approx = true} : vector<64x1xf32> -> vector<64x1xf32>
    %96 = vector.broadcast %95 : vector<64x1xf32> to vector<64x8xf32>
    %97 = arith.mulf %94, %96 : vector<64x8xf32>
    %98 = vector.extract_strided_slice %62 {offsets = [0, 16], sizes = [64, 8], strides = [1, 1]} : vector<64x32xbf16> to vector<64x8xbf16>
    %99 = vector.extract_strided_slice %61 {offsets = [0, 16], sizes = [88, 8], strides = [1, 1]} : vector<88x64xbf16> to vector<88x8xbf16>
    %cst_26 = arith.constant dense<0.000000e+00> : vector<64x88xf32>
    %100 = tpu.matmul %98, %99, %cst_26 {dimension_numbers = #tpu.dot_dimension_numbers<[1], [1], [0], [0], [0, 0, 1, 0], [], []>} : vector<64x8xbf16>, vector<88x8xbf16>, vector<64x88xf32> -> vector<64x88xf32>
    %101 = arith.addf %100, %63 : vector<64x88xf32>
    %cst_27 = arith.constant dense<0xFF800000> : vector<64xf32>
    %102 = vector.multi_reduction <maximumf>, %101, %cst_27 [1] : vector<64x88xf32> to vector<64xf32>
    %103 = vector.shape_cast %102 : vector<64xf32> to vector<64x1xf32>
    %104 = vector.broadcast %103 : vector<64x1xf32> to vector<64x88xf32>
    %105 = arith.subf %101, %104 : vector<64x88xf32>
    %106 = math.exp %105 : vector<64x88xf32>
    %cst_28 = arith.constant dense<0.000000e+00> : vector<64xf32>
    %107 = vector.multi_reduction <add>, %106, %cst_28 [1] : vector<64x88xf32> to vector<64xf32>
    %108 = vector.shape_cast %107 : vector<64xf32> to vector<64x1xf32>
    %109 = arith.truncf %106 : vector<64x88xf32> to vector<64x88xbf16>
    %110 = vector.extract_strided_slice %61 {offsets = [0, 48], sizes = [88, 8], strides = [1, 1]} : vector<88x64xbf16> to vector<88x8xbf16>
    %cst_29 = arith.constant dense<0.000000e+00> : vector<64x8xf32>
    %111 = tpu.matmul %109, %110, %cst_29 {dimension_numbers = #tpu.dot_dimension_numbers<[1], [0], [0], [1], [0, 0, 1, 1], [], []>} : vector<64x88xbf16>, vector<88x8xbf16>, vector<64x8xf32> -> vector<64x8xf32>
    %112 = tpu.reciprocal %108 {approx = true} : vector<64x1xf32> -> vector<64x1xf32>
    %113 = vector.broadcast %112 : vector<64x1xf32> to vector<64x8xf32>
    %114 = arith.mulf %111, %113 : vector<64x8xf32>
    %115 = vector.extract_strided_slice %62 {offsets = [0, 24], sizes = [64, 8], strides = [1, 1]} : vector<64x32xbf16> to vector<64x8xbf16>
    %116 = vector.extract_strided_slice %61 {offsets = [0, 24], sizes = [88, 8], strides = [1, 1]} : vector<88x64xbf16> to vector<88x8xbf16>
    %cst_30 = arith.constant dense<0.000000e+00> : vector<64x88xf32>
    %117 = tpu.matmul %115, %116, %cst_30 {dimension_numbers = #tpu.dot_dimension_numbers<[1], [1], [0], [0], [0, 0, 1, 0], [], []>} : vector<64x8xbf16>, vector<88x8xbf16>, vector<64x88xf32> -> vector<64x88xf32>
    %118 = arith.addf %117, %63 : vector<64x88xf32>
    %cst_31 = arith.constant dense<0xFF800000> : vector<64xf32>
    %119 = vector.multi_reduction <maximumf>, %118, %cst_31 [1] : vector<64x88xf32> to vector<64xf32>
    %120 = vector.shape_cast %119 : vector<64xf32> to vector<64x1xf32>
    %121 = vector.broadcast %120 : vector<64x1xf32> to vector<64x88xf32>
    %122 = arith.subf %118, %121 : vector<64x88xf32>
    %123 = math.exp %122 : vector<64x88xf32>
    %cst_32 = arith.constant dense<0.000000e+00> : vector<64xf32>
    %124 = vector.multi_reduction <add>, %123, %cst_32 [1] : vector<64x88xf32> to vector<64xf32>
    %125 = vector.shape_cast %124 : vector<64xf32> to vector<64x1xf32>
    %126 = arith.truncf %123 : vector<64x88xf32> to vector<64x88xbf16>
    %127 = vector.extract_strided_slice %61 {offsets = [0, 56], sizes = [88, 8], strides = [1, 1]} : vector<88x64xbf16> to vector<88x8xbf16>
    %cst_33 = arith.constant dense<0.000000e+00> : vector<64x8xf32>
    %128 = tpu.matmul %126, %127, %cst_33 {dimension_numbers = #tpu.dot_dimension_numbers<[1], [0], [0], [1], [0, 0, 1, 1], [], []>} : vector<64x88xbf16>, vector<88x8xbf16>, vector<64x8xf32> -> vector<64x8xf32>
    %129 = tpu.reciprocal %125 {approx = true} : vector<64x1xf32> -> vector<64x1xf32>
    %130 = vector.broadcast %129 : vector<64x1xf32> to vector<64x8xf32>
    %131 = arith.mulf %128, %130 : vector<64x8xf32>
    %132 = tpu.concatenate %80, %97, %114, %131 in 1 : vector<64x8xf32>, vector<64x8xf32>, vector<64x8xf32>, vector<64x8xf32> -> vector<64x32xf32>
    %133 = arith.truncf %132 : vector<64x32xf32> to vector<64x32xbf16>
    %c0_34 = arith.constant 0 : index
    %c0_35 = arith.constant 0 : index
    %134 = vector.load %arg4[%c0_34, %c0_35] : memref<32x32xbf16, #tpu.memory_space<vmem>>, vector<32x32xbf16>
    %cst_36 = arith.constant dense<0.000000e+00> : vector<64x32xf32>
    %135 = tpu.matmul %133, %134, %cst_36 {dimension_numbers = #tpu.dot_dimension_numbers<[1], [0], [0], [1], [0, 0, 1, 1], [], []>} : vector<64x32xbf16>, vector<32x32xbf16>, vector<64x32xf32> -> vector<64x32xf32>
    %c0_37 = arith.constant 0 : index
    %c0_38 = arith.constant 0 : index
    %136 = vector.load %arg5[%c0_37, %c0_38] : memref<1x32xf32, #tpu.memory_space<vmem>>, vector<1x32xf32>
    %137 = vector.broadcast %136 : vector<1x32xf32> to vector<64x32xf32>
    %138 = arith.addf %135, %137 : vector<64x32xf32>
    %c0_39 = arith.constant 0 : index
    %c0_40 = arith.constant 0 : index
    %c0_41 = arith.constant 0 : index
    %139 = vector.load %arg9[%c0_39, %c0_40, %c0_41] : memref<1x64x32xf32, #tpu.memory_space<vmem>>, vector<1x64x32xf32>
    %140 = vector.shape_cast %139 : vector<1x64x32xf32> to vector<64x32xf32>
    %141 = vector.shape_cast %138 : vector<64x32xf32> to vector<1x64x32xf32>
    tpu.vector_store %arg9[%c0_39, %c0_40, %c0_41], %141 {strides = array<i32>} : memref<1x64x32xf32, #tpu.memory_space<vmem>>, vector<1x64x32xf32>,
    return
  }
  func.func @transform_0(%arg0: i32) -> (i32, i32, i32) {
    %c0_i32 = arith.constant 0 : i32
    %c0_i32_0 = arith.constant 0 : i32
    %c0_i32_1 = arith.constant 0 : i32
    return %arg0, %c0_i32, %c0_i32_0 : i32, i32, i32
  }
  func.func @transform_1(%arg0: i32) -> (i32, i32) {
    %c0_i32 = arith.constant 0 : i32
    %c0_i32_0 = arith.constant 0 : i32
    %c0_i32_1 = arith.constant 0 : i32
    return %c0_i32, %c0_i32_0 : i32, i32
  }
  func.func @transform_2(%arg0: i32) -> (i32, i32) {
    %c0_i32 = arith.constant 0 : i32
    %c0_i32_0 = arith.constant 0 : i32
    %c0_i32_1 = arith.constant 0 : i32
    return %c0_i32, %c0_i32_0 : i32, i32
  }
  func.func @transform_3(%arg0: i32) -> (i32, i32) {
    %c0_i32 = arith.constant 0 : i32
    %c0_i32_0 = arith.constant 0 : i32
    %c0_i32_1 = arith.constant 0 : i32
    return %c0_i32, %c0_i32_0 : i32, i32
  }
  func.func @transform_4(%arg0: i32) -> (i32, i32) {
    %c0_i32 = arith.constant 0 : i32
    %c0_i32_0 = arith.constant 0 : i32
    %c0_i32_1 = arith.constant 0 : i32
    return %c0_i32, %c0_i32_0 : i32, i32
  }
  func.func @transform_5(%arg0: i32) -> (i32, i32) {
    %c0_i32 = arith.constant 0 : i32
    %c0_i32_0 = arith.constant 0 : i32
    %c0_i32_1 = arith.constant 0 : i32
    return %c0_i32, %c0_i32_0 : i32, i32
  }
  func.func @transform_6(%arg0: i32) -> (i32, i32, i32) {
    %c0_i32 = arith.constant 0 : i32
    %c0_i32_0 = arith.constant 0 : i32
    %c0_i32_1 = arith.constant 0 : i32
    %c0_i32_2 = arith.constant 0 : i32
    return %c0_i32, %c0_i32_0, %c0_i32_1 : i32, i32, i32
  }
  func.func @transform_7(%arg0: i32) -> (i32, i32, i32) {
    %c0_i32 = arith.constant 0 : i32
    %c0_i32_0 = arith.constant 0 : i32
    %c0_i32_1 = arith.constant 0 : i32
    %c0_i32_2 = arith.constant 0 : i32
    return %c0_i32, %c0_i32_0, %c0_i32_1 : i32, i32, i32
  }
  func.func @transform_8(%arg0: i32) -> (i32, i32, i32) {
    %c0_i32 = arith.constant 0 : i32
    %c0_i32_0 = arith.constant 0 : i32
    %c0_i32_1 = arith.constant 0 : i32
    return %arg0, %c0_i32, %c0_i32_0 : i32, i32, i32
  }
}

</mosaic_0001>

<bundles_post_ra>
// kernel: tpu_custom_call.1
= control target key start
LH: loop header
LB: loop body
LE: loop exit
PB: predicated region body
PF: predicated region fallthrough
CT: control target
= control target key end

     0   :  { %s2333_s27 = smov 0   ;;  %s3319_s0 = inlined_call_operand.vmem [shape: f32[2,64,32], index: 0, kind: input, shape index: {}]   ;;  %s3320_s1 = inlined_call_operand.vmem [shape: bf16[32,96], index: 1, kind: input, shape index: {}]   ;;  %s3321_s2 = inlined_call_operand.vmem [shape: f32[1,96], index: 2, kind: input, shape index: {}]   ;;  %s3322_s3 = inlined_call_operand.vmem [shape: bf16[32,32], index: 3, kind: input, shape index: {}]   ;;  %s3323_s4 = inlined_call_operand.vmem [shape: f32[1,32], index: 4, kind: input, shape index: {}]   ;;  %s3324_s5 = inlined_call_operand.vmem [shape: f32[64,88], index: 5, kind: input, shape index: {}]   ;;  %s3325_s6 = inlined_call_operand.vmem [shape: f32[2,24,64], index: 6, kind: input, shape index: {}]   ;;  %s3326_s7 = inlined_call_operand.vmem [shape: f32[2,2,64], index: 7, kind: input, shape index: {}]   ;;  %s3327_s8 = inlined_call_operand.vmem [shape: f32[2,64,32], index: 8, kind: output, shape index: {}]  }
   0x1 LB: > { %s1971_s28 = sadd.s32 4294967295, %s2271_s27   ;;  %p1975_p0 = scmp.ge.s32.totalorder %s2271_s27, 1  ;;  %s2271_s27 = sphi %s2333_s27, %s18_s27  }
   0x2   : > { %p262_p1 = scmp.lt.s32.totalorder %s2271_s27, 3 }
   0x4   : > { %p263_p2 = pnand %p1975_p0, %p262_p1 }
   0x5   : > { %p296_p3 = scmp.lt.s32.totalorder (!%p263_p2), %s1971_s28, 1  ;;  %s2273_s11 = smov (!%p263_p2), 32  }
   0x6   : > { %266 = sbr.rel (%p263_p2) target bundleno = 1607 (0x647), region = 52  ;;  %s2275_s15 = smov (!%p263_p2), 88  }
   0x7   : > { %s2276_s16 = smov (!%p263_p2), 64   ;;  %s2277_s17 = smov (!%p263_p2), 80  }
   0x8   : > { %s2278_s19 = smov (!%p263_p2), 120   ;;  %s2279_s20 = smov (!%p263_p2), 72  }
   0x9   : > { %s2281_s22 = smov (!%p263_p2), 112   ;;  %s2285_s23 = smov (!%p263_p2), 8  }
   0xa   : > { %s2286_s24 = smov (!%p263_p2), 24   ;;  %s2287_s25 = smov (!%p263_p2), 16  }
   0xb   : > { %v2041_v0 = vld [vmem:[%s3320_s1 + $0x8] sm:$0xff]  ;;  %v385_v2 = vld [vmem:[%s3325_s6 + $0x20] sm:$0xff]  ;;  %s3329_s28 = smov (!%p296_p3, %s1971_s28), 1  ;;  %v383_v5 = vld [vmem:[%s3325_s6 + $0x10] sm:$0xff]  ;;  %vm339_vm0 = vcmask 261120   ;;  %vm401_vm1 = vcmask 785664  }
   0xc   : > { %v382_v1 = vld [vmem:[%s3325_s6 + $0x8] sm:$0xff]  ;;  %358 = vmatpush.bf16.msra.mxu0 %v2041_v0  ;;  %2044 = vmatpush.bf16.msra.mxu3 %v2041_v0  ;;  %v2040_v3 = vld [vmem:[%s3320_s1] sm:$0xff]  ;;  %s2038_s18 = sshll.u32 %s3329_s28, 6  ;;  %v384_v13 = vld [vmem:[%s3325_s6 + $0x18] sm:$0xff]  ;;  %vm683_vm2 = vcmask 1041409   ;;  %vm686_vm3 = vcmask 1042434  }
   0xd   : > { %554 = vrot.lane.b32.xlu0 %v382_v1, %s2273_s11  ;;  %v381_v4 = vld [vmem:[%s3325_s6] sm:$0xff]  ;;  %615 = vrot.lane.b32.xlu1 %v385_v2, %s2273_s11  ;;  %s300_s21 = scalar_lea.vmem %s3319_s0, %s2038_s18  ;;  %v386_v12 = vld [vmem:[%s3325_s6 + $0x28] sm:$0xff]  ;;  %vm689_vm4 = vcmask 1043459   ;;  %vm692_vm5 = vcmask 1044484   ;;  %vm695_vm6 = vcmask 1045509   ;;  %vm698_vm7 = vcmask 1046534  }
   0xe   : > { %390 = vrot.lane.b32.xlu2 %v381_v4, %s2273_s11  ;;  %v307_v6 = vld [vmem:[%s300_s21] sm:$0xff]  ;;  %v308_v7 = vld [vmem:[%s300_s21 + $0x8] sm:$0xff]  ;;  %v309_v19 = vld [vmem:[%s300_s21 + $0x10] sm:$0xff]  ;;  %vm701_vm8 = vcmask 1047559   ;;  %vm750_vm9 = vcmask 1043456   ;;  %vm811_vm10 = vcmask 64512  }
   0xf   : > { %v311_v8 = vld [vmem:[%s300_s21 + $0x20] sm:$0xff]  ;;  %v315_v9 = vpack.c.bf16 %v308_v7, %v307_v6  ;;  %v312_v10 = vld [vmem:[%s300_s21 + $0x28] sm:$0xff]  ;;  %v310_v20 = vld [vmem:[%s300_s21 + $0x18] sm:$0xff]  ;;  %vm871_vm11 = vcmask 719872   ;;  %vm1825_vm12 = vcmask 130048   ;;  %vm1834_vm13 = vcmask 195584  }
  0x10   : > { %359 = vmatpush.bf16.msra.mxu0 %v2040_v3  ;;  %2045 = vmatpush.bf16.msra.mxu3 %v2040_v3  ;;  %v317_v11 = vpack.c.bf16 %v312_v10, %v311_v8  ;;  %v388_v14 = vld [vmem:[%s3326_s7 + $0x2] sm:$0x3]  ;;  %v387_v16 = vld [vmem:[%s3326_s7] sm:$0x3]  ;;  %v313_v21 = vld [vmem:[%s300_s21 + $0x30] sm:$0xff]  ;;  %v316_v23 = vpack.c.bf16 %v310_v20, %v309_v19 }
  0x11   : > { %v604_v15 = vperm.slane %v388_v14, 0  ;;  %v665_v17 = vperm.slane %v388_v14, 1  ;;  %v458_v18 = vperm.slane %v387_v16, 0  ;;  %v314_v22 = vld [vmem:[%s300_s21 + $0x38] sm:$0xff]  ;;  %v539_v24 = vperm.slane %v387_v16, 1  ;;  %s2280_s21 = smov 104  }
  0x12   : > { %v318_v25 = vpack.c.bf16 %v314_v22, %v313_v21  ;;  %v2396_v27 = vld [vmem:[%s3321_s2] ss:$0 sm:$0xff] }
  0x13   : > { %1988 = vmatmul.msk.bf16.vlgmr.msra.gmra.mxu0 %vm339_vm0, %v315_v9  ;;  %1990 = vmatmul.msk.bf16.vlgmr.msra.gmra.mxu3 %vm339_vm0, %v317_v11 }
  0x15   : > { %556 = vrot.lane.b32.xlu0 %v383_v5, %s2273_s11  ;;  %617 = vrot.lane.b32.xlu1 %v386_v12, %s2273_s11 }
  0x16   : > { %472 = vrot.lane.b32.xlu2 %v384_v13, %s2273_s11 }
  0x1d   : > { %606 = vrot.lane.b32.xlu0 %v604_v15, %s2273_s11  ;;  %667 = vrot.lane.b32.xlu1 %v665_v17, %s2273_s11 }
  0x1e   : > { %460 = vrot.lane.b32.xlu2 %v458_v18, %s2273_s11 }
  0x23   : > { %1989 = vmatmul.msk.bf16.gmra.mxu0 %vm339_vm0, %v316_v23  ;;  %1991 = vmatmul.msk.bf16.gmra.mxu3 %vm339_vm0, %v318_v25 }
  0x25   : > { %541 = vrot.lane.b32.xlu0 %v539_v24, %s2273_s11  ;;  %s2274_s11 = smov 96  }
  0x68   : > { %v2398_v28 = vpop.permute.xlu2 %390 }
  0x70   : > { %v2410_v36 = vpop.permute.xlu2 %472 }
  0x7f   : > { %v2400_v29 = vpop.permute.xlu0 %554  ;;  %v2418_v41 = vpop.permute.xlu1 %615 }
  0x87   : > { %v2416_v40 = vpop.permute.xlu0 %556  ;;  %v2445_v6 = vpop.permute.xlu1 %617 }
  0x90   : > { %v361_v26 = vpop.f32.mrf.mxu0 }
  0x91   : > { %v362_v30 = vadd.f32 %v2396_v27, %v361_v26 }
  0x93   : > { %v393_v34 = vmul.f32 %v2398_v28, %v362_v30  ;;  %v560_v39 = vmul.f32 %v2400_v29, %v362_v30  ;;  %v475_v54 = vmul.f32 %v2410_v36, %v362_v30  ;;  %v752_v61 = vpack.c.bf16 %v362_v30, %v362_v30 }
  0x94   : > { %v621_v63 = vmul.f32 %v2418_v41, %v362_v30 }
  0x95   : > { %v402_v38 = vsel %vm401_vm1, %v393_v34, 0.0  ;;  %v568_v50 = vsel %vm401_vm1, %v560_v39, 0.0  ;;  %v483_v3 = vsel %vm401_vm1, %v475_v54, 0.0  ;;  %v779_v16 = vunpack.c.l.b16 %v752_v61 }
  0x96   : > { %v371_v31 = vpop.f32.mrf.mxu3  ;;  %v403_v46 = vrot.slane %v402_v38, 4  ;;  %v629_v17 = vsel %vm401_vm1, %v621_v63, 0.0  ;;  %v484_v25 = vrot.slane %v483_v3, 4  ;;  %v2471_v63 = vpop.permute.xlu0 %606 }
  0x97   : > { %v2404_v32 = vadd.f32 %v2396_v27, %v371_v31 }
  0x98   : > { %v363_v33 = vpop.f32.mrf.mxu0  ;;  %v404_v57 = vadd.f32 %v403_v46, %v402_v38 }
  0x99   : > { %v2408_v35 = vadd.f32 %v2396_v27, %v363_v33  ;;  %v397_v37 = vmul.f32 %v2398_v28, %v2404_v32  ;;  %v479_v42 = vmul.f32 %v2410_v36, %v2404_v32  ;;  %v564_v8 = vmul.f32 %v2400_v29, %v2404_v32 }
  0x9a   : > { %v405_v7 = vrot.slane %v404_v57, 2 }
  0x9b   : > { %v561_v43 = vmul.f32 %v2416_v40, %v2408_v35  ;;  %v476_v44 = vmul.f32 %v2410_v36, %v2408_v35  ;;  %v430_v47 = vsel %vm401_vm1, %v397_v37, 0.0  ;;  %v394_v48 = vmul.f32 %v2398_v28, %v2408_v35 }
  0x9c   : > { %v511_v51 = vsel %vm401_vm1, %v479_v42, 0.0  ;;  %v431_v55 = vrot.slane %v430_v47, 4  ;;  %v622_v19 = vmul.f32 %v2445_v6, %v2408_v35  ;;  %v406_v24 = vadd.f32 %v405_v7, %v404_v57 }
  0x9d   : > { %v569_v49 = vsel %vm401_vm1, %v561_v43, 0.0  ;;  %v490_v56 = vsel %vm401_vm1, %v476_v44, 0.0  ;;  %v409_v58 = vsel %vm401_vm1, %v394_v48, 0.0  ;;  %v512_v62 = vrot.slane %v511_v51, 4 }
  0x9e   : > { %v373_v45 = vpop.f32.mrf.mxu3  ;;  %v570_v52 = vadd.f32 %v569_v49, %v568_v50  ;;  %v491_v0 = vrot.slane %v490_v56, 4  ;;  %v432_v4 = vadd.f32 %v431_v55, %v430_v47  ;;  %v410_v5 = vrot.slane %v409_v58, 4 }
  0x9f   : > { %v2433_v53 = vadd.f32 %v2396_v27, %v373_v45  ;;  %v513_v12 = vadd.f32 %v512_v62, %v511_v51  ;;  %v586_v33 = vsel %vm401_vm1, %v564_v8, 0.0  ;;  %v753_v39 = vpack.c.bf16 %v2408_v35, %v2408_v35 }
  0xa0   : > { %v571_v59 = vrot.slane %v570_v52, 4  ;;  %v366_v11 = vpop.f32.mrf.mxu0  ;;  %v492_v18 = vadd.f32 %v491_v0, %v490_v56  ;;  %v433_v20 = vrot.slane %v432_v4, 2  ;;  %v411_v21 = vadd.f32 %v410_v5, %v409_v58 }
  0xa1   : > { %v398_v60 = vmul.f32 %v2398_v28, %v2433_v53  ;;  %v480_v2 = vmul.f32 %v2410_v36, %v2433_v53  ;;  %v565_v15 = vmul.f32 %v2416_v40, %v2433_v53  ;;  %v2457_v23 = vadd.f32 %v2396_v27, %v366_v11 }
  0xa2   : > { %v572_v9 = vadd.f32 %v571_v59, %v570_v52  ;;  %v514_v31 = vrot.slane %v513_v12, 2  ;;  %v493_v38 = vrot.slane %v492_v18, 2  ;;  %v434_v44 = vadd.f32 %v433_v20, %v432_v4 }
  0xa3   : > { %v437_v1 = vsel %vm401_vm1, %v398_v60, 0.0  ;;  %v518_v10 = vsel %vm401_vm1, %v480_v2, 0.0  ;;  %v587_v22 = vsel %vm401_vm1, %v565_v15, 0.0  ;;  %v395_v37 = vmul.f32 %v2398_v28, %v2457_v23 }
  0xa4   : > { %v438_v13 = vrot.slane %v437_v1, 4  ;;  %v519_v14 = vrot.slane %v518_v10, 4  ;;  %v573_v26 = vrot.slane %v572_v9, 2  ;;  %v588_v42 = vadd.f32 %v587_v22, %v586_v33 }
  0xa5   : > { %v477_v43 = vmul.f32 %v2410_v36, %v2457_v23  ;;  %v412_v45 = vrot.slane %v411_v21, 2  ;;  %v630_v46 = vsel %vm401_vm1, %v622_v19, 0.0  ;;  %v416_v47 = vsel %vm401_vm1, %v395_v37, 0.0 }
  0xa6   : > { %v520_v30 = vadd.f32 %v519_v14, %v518_v10  ;;  %v439_v34 = vadd.f32 %v438_v13, %v437_v1  ;;  %v485_v48 = vadd.f32 %v484_v25, %v483_v3  ;;  %v625_v49 = vmul.f32 %v2418_v41, %v2404_v32  ;;  %v376_v14 = vpop.f32.mrf.mxu3 }
  0xa7   : > { %v574_v50 = vadd.f32 %v573_v26, %v572_v9  ;;  %v407_v52 = vrot.slane %v406_v24, 1  ;;  %v515_v54 = vadd.f32 %v514_v31, %v513_v12  ;;  %v497_v35 = vsel %vm401_vm1, %v477_v43, 0.0 }
  0xa8   : > { %v521_v51 = vrot.slane %v520_v30, 2  ;;  %v440_v55 = vrot.slane %v439_v34, 2  ;;  %v494_v56 = vadd.f32 %v493_v38, %v492_v18  ;;  %v631_v57 = vadd.f32 %v630_v46, %v629_v17 }
  0xa9   : > { %v589_v58 = vrot.slane %v588_v42, 4  ;;  %v417_v59 = vrot.slane %v416_v47, 4  ;;  %v435_v60 = vrot.slane %v434_v44, 1  ;;  %v413_v61 = vadd.f32 %v412_v45, %v411_v21 }
  0xaa   : > { %v780_v62 = vunpack.c.l.b16 %v753_v39  ;;  %v626_v0 = vmul.f32 %v2445_v6, %v2433_v53  ;;  %v486_v1 = vrot.slane %v485_v48, 2  ;;  %v575_v2 = vrot.slane %v574_v50, 1 }
  0xab   : > { %v522_v3 = vadd.f32 %v521_v51, %v520_v30  ;;  %v498_v4 = vrot.slane %v497_v35, 4  ;;  %v2475_v5 = vadd.f32 %v407_v52, %v406_v24  ;;  %v516_v7 = vrot.slane %v515_v54, 1  ;;  %v2501_v52 = vpop.permute.xlu0 %541 }
  0xac   : > { %v647_v8 = vsel %vm401_vm1, %v625_v49, 0.0  ;;  %v441_v9 = vadd.f32 %v440_v55, %v439_v34  ;;  %v495_v10 = vrot.slane %v494_v56, 1  ;;  %v632_v11 = vrot.slane %v631_v57, 4  ;;  %v368_v49 = vpop.f32.mrf.mxu0 }
  0xad   : > { %v590_v12 = vadd.f32 %v589_v58, %v588_v42  ;;  %v418_v13 = vadd.f32 %v417_v59, %v416_v47  ;;  %v2478_v15 = vadd.f32 %v435_v60, %v434_v44  ;;  %v414_v17 = vrot.slane %v413_v61, 1 }
  0xae   : > { %v2480_v18 = vpack.c.b16 %v780_v62, %v779_v16  ;;  %v648_v19 = vsel %vm401_vm1, %v626_v0, 0.0  ;;  %v576_v20 = vadd.f32 %v575_v2, %v574_v50  ;;  %v523_v21 = vrot.slane %v522_v3, 1 }
  0xaf   : > { %v499_v22 = vadd.f32 %v498_v4, %v497_v35  ;;  %v562_v24 = vmul.f32 %v2400_v29, %v2457_v23  ;;  %v517_v25 = vadd.f32 %v516_v7, %v515_v54  ;;  %v442_v26 = vrot.slane %v441_v9, 1 }
  0xb0   : > { %v623_v30 = vmul.f32 %v2418_v41, %v2457_v23  ;;  %v2488_v31 = vadd.f32 %v2396_v27, %v376_v14  ;;  %v496_v33 = vadd.f32 %v495_v10, %v494_v56  ;;  %v2490_v34 = vadd.f32 %v632_v11, %v631_v57 }
  0xb1   : > { %v591_v16 = vrot.slane %v590_v12, 2  ;;  %v419_v37 = vrot.slane %v418_v13, 2  ;;  %v415_v38 = vadd.f32 %v414_v17, %v413_v61  ;;  %v2492_v39 = vadd.f32 %v648_v19, %v647_v8 }
  0xb2   : > { %v487_v42 = vadd.f32 %v486_v1, %v485_v48  ;;  %v399_v43 = vmul.f32 %v2398_v28, %v2488_v31  ;;  %v2497_v44 = vadd.f32 %v2471_v63, %v576_v20  ;;  %v524_v45 = vadd.f32 %v523_v21, %v522_v3 }
  0xb3   : > { %v500_v46 = vrot.slane %v499_v22, 2  ;;  %v577_v47 = vsel %vm401_vm1, %v562_v24, 0.0  ;;  %v443_v50 = vadd.f32 %v442_v26, %v441_v9  ;;  %v638_v51 = vsel %vm401_vm1, %v623_v30, 0.0 }
  0xb4   : > { %v444_v54 = vsel %vm401_vm1, %v399_v43, 0.0  ;;  %v481_v48 = vmul.f32 %v2410_v36, %v2488_v31  ;;  %v592_v55 = vadd.f32 %v591_v16, %v590_v12  ;;  %v420_v35 = vadd.f32 %v419_v37, %v418_v13 }
  0xb5   : > { %v545_v56 = vadd.f32 %v2501_v52, %v496_v33  ;;  %v445_v57 = vrot.slane %v444_v54, 4  ;;  %v488_v58 = vrot.slane %v487_v42, 1  ;;  %v2508_v59 = vadd.f32 %v2501_v52, %v517_v25 }
  0xb6   : > { %v525_v60 = vsel %vm401_vm1, %v481_v48, 0.0  ;;  %v2512_v61 = vadd.f32 %v2396_v27, %v368_v49  ;;  %v501_v62 = vadd.f32 %v500_v46, %v499_v22  ;;  %v2515_v0 = vadd.f32 %v2501_v52, %v524_v45  ;;  %v2529_v22 = vpop.permute.xlu2 %460 }
  0xb7   : > { %v446_v1 = vadd.f32 %v445_v57, %v444_v54  ;;  %v526_v2 = vrot.slane %v525_v60, 4  ;;  %v593_v9 = vrot.slane %v592_v55, 1  ;;  %v421_v10 = vrot.slane %v420_v35, 1 }
  0xb8   : > { %v396_v3 = vmul.f32 %v2398_v28, %v2512_v61  ;;  %v478_v4 = vmul.f32 %v2410_v36, %v2512_v61  ;;  %v563_v7 = vmul.f32 %v2416_v40, %v2512_v61  ;;  %v624_v8 = vmul.f32 %v2445_v6, %v2512_v61 }
  0xb9   : > { %v447_v11 = vrot.slane %v446_v1, 2  ;;  %v527_v12 = vadd.f32 %v526_v2, %v525_v60  ;;  %v489_v20 = vadd.f32 %v488_v58, %v487_v42  ;;  %v712_v21 = vrot.slane %v545_v56, 7 }
  0xba   : > { %v423_v13 = vsel %vm401_vm1, %v396_v3, 0.0  ;;  %v504_v14 = vsel %vm401_vm1, %v478_v4, 0.0  ;;  %v578_v17 = vsel %vm401_vm1, %v563_v7, 0.0  ;;  %v639_v19 = vsel %vm401_vm1, %v624_v8, 0.0 }
  0xbb   : > { %v424_v24 = vrot.slane %v423_v13, 4  ;;  %v505_v25 = vrot.slane %v504_v14, 4  ;;  %v502_v26 = vrot.slane %v501_v62, 1  ;;  %v718_v30 = vrot.slane %v2508_v59, 4 }
  0xbc   : > { %v579_v33 = vadd.f32 %v578_v17, %v577_v47  ;;  %v640_v16 = vadd.f32 %v639_v19, %v638_v51  ;;  %v720_v37 = vrot.slane %v2515_v0, 3  ;;  %v464_v43 = vadd.f32 %v2529_v22, %v415_v38  ;;  %v378_v17 = vpop.f32.mrf.mxu3 }
  0xbd   : > { %v425_v45 = vadd.f32 %v424_v24, %v423_v13  ;;  %v506_v46 = vadd.f32 %v505_v25, %v504_v14  ;;  %v422_v49 = vadd.f32 %v421_v10, %v420_v35  ;;  %v463_v42 = vadd.f32 %v2529_v22, %v2475_v5 }
  0xbe   : > { %v448_v54 = vadd.f32 %v447_v11, %v446_v1  ;;  %v528_v48 = vrot.slane %v527_v12, 2  ;;  %v2538_v56 = vadd.f32 %v2529_v22, %v2478_v15  ;;  %v580_v47 = vrot.slane %v579_v33, 4 }
  0xbf   : > { %v426_v57 = vrot.slane %v425_v45, 2  ;;  %v507_v58 = vrot.slane %v506_v46, 2  ;;  %v2540_v51 = vadd.f32 %v593_v9, %v592_v55  ;;  %v503_v60 = vadd.f32 %v502_v26, %v501_v62 }
  0xc0   : > { %v544_v38 = vadd.f32 %v2501_v52, %v489_v20  ;;  %v641_v2 = vrot.slane %v640_v16, 4  ;;  %v2544_v35 = vadd.f32 %v2529_v22, %v443_v50  ;;  %v682_v3 = vrot.slane %v464_v43, 7 }
  0xc1   : > { %v427_v5 = vadd.f32 %v426_v57, %v425_v45  ;;  %v508_v1 = vadd.f32 %v507_v58, %v506_v46  ;;  %v465_v15 = vadd.f32 %v2529_v22, %v422_v49  ;;  %v449_v7 = vrot.slane %v448_v54, 1 }
  0xc2   : > { %v2547_v4 = vsel %vm683_vm2, %v712_v21, %v544_v38  ;;  %v529_v8 = vadd.f32 %v528_v48, %v527_v12  ;;  %v691_v55 = vrot.slane %v2538_v56, 4  ;;  %v581_v10 = vadd.f32 %v580_v47, %v579_v33 }
  0xc3   : > { %v428_v9 = vrot.slane %v427_v5, 1  ;;  %v509_v62 = vrot.slane %v508_v1, 1  ;;  %v546_v11 = vadd.f32 %v2501_v52, %v503_v60  ;;  %v566_v50 = vmul.f32 %v2400_v29, %v2488_v31 }
  0xc4   : > { %v627_v13 = vmul.f32 %v2418_v41, %v2488_v31  ;;  %v642_v14 = vadd.f32 %v641_v2, %v640_v16  ;;  %v684_v19 = vsel %vm683_vm2, %v682_v3, %v463_v42  ;;  %v694_v20 = vrot.slane %v2544_v35, 3 }
  0xc5   : > { %v429_v12 = vadd.f32 %v428_v9, %v427_v5  ;;  %v650_v21 = vrot.slane %v2492_v39, 4  ;;  %v685_v24 = vrot.slane %v465_v15, 6  ;;  %v450_v25 = vadd.f32 %v449_v7, %v448_v54 }
  0xc6   : > { %v530_v26 = vrot.slane %v529_v8, 1  ;;  %v510_v33 = vadd.f32 %v509_v62, %v508_v1  ;;  %v758_v43 = vpack.c.bf16 %v2488_v31, %v2488_v31  ;;  %v582_v29 = vrot.slane %v581_v10, 2 }
  0xc7   : > { %v634_v45 = vrot.slane %v2490_v34, 2  ;;  %v379_v41 = vadd.f32 %v2396_v27, %v378_v17  ;;  %v714_v16 = vrot.slane %v546_v11, 6  ;;  %v595_v46 = vsel %vm401_vm1, %v566_v50, 0.0 }
  0xc8   : > { %v656_v49 = vsel %vm401_vm1, %v627_v13, 0.0  ;;  %v643_v42 = vrot.slane %v642_v14, 2  ;;  %v466_v48 = vadd.f32 %v2529_v22, %v429_v12  ;;  %v651_v54 = vadd.f32 %v650_v21, %v2492_v39 }
  0xc9   : > { %v400_v57 = vmul.f32 %v2398_v28, %v379_v41  ;;  %v482_v58 = vmul.f32 %v2410_v36, %v379_v41  ;;  %v2570_v31 = vadd.f32 %v2529_v22, %v450_v25  ;;  %v531_v47 = vadd.f32 %v530_v26, %v529_v8 }
  0xca   : > { %v547_v27 = vadd.f32 %v2501_v52, %v510_v33  ;;  %v583_v60 = vadd.f32 %v582_v29, %v581_v10  ;;  %v635_v38 = vadd.f32 %v634_v45, %v2490_v34  ;;  %v785_v5 = vunpack.c.l.b16 %v758_v43 }
  0xcb   : > { %v451_v2 = vsel %vm401_vm1, %v400_v57, 0.0  ;;  %v532_v3 = vsel %vm401_vm1, %v482_v58, 0.0  ;;  %v644_v28 = vadd.f32 %v643_v42, %v642_v14  ;;  %v688_v39 = vrot.slane %v466_v48, 5 }
  0xcc   : > { %v652_v36 = vrot.slane %v651_v54, 2  ;;  %v452_v1 = vrot.slane %v451_v2, 4  ;;  %v533_v15 = vrot.slane %v532_v3, 4  ;;  %v2577_v7 = vadd.f32 %v2501_v52, %v531_v47 }
  0xcd   : > { %v716_v8 = vrot.slane %v547_v27, 5  ;;  %v687_v9 = vsel %vm686_vm3, %v685_v24, %v684_v19  ;;  %v584_v34 = vrot.slane %v583_v60, 1  ;;  %v636_v62 = vrot.slane %v635_v38, 1 }
  0xce   : > { %v697_v10 = vrot.slane %v2570_v31, 2  ;;  %v453_v11 = vadd.f32 %v452_v1, %v451_v2  ;;  %v645_v50 = vrot.slane %v644_v28, 1  ;;  %v534_v13 = vadd.f32 %v533_v15, %v532_v3 }
  0xcf   : > { %v567_v14 = vmul.f32 %v2416_v40, %v379_v41  ;;  %v628_v17 = vmul.f32 %v2445_v6, %v379_v41  ;;  %v653_v12 = vadd.f32 %v652_v36, %v651_v54  ;;  %v690_v21 = vsel %vm689_vm4, %v688_v39, %v687_v9 }
  0xd0   : > { %v715_v25 = vsel %vm686_vm3, %v714_v16, %v2547_v4  ;;  %v454_v26 = vrot.slane %v453_v11, 2  ;;  %v535_v24 = vrot.slane %v534_v13, 2  ;;  %v759_v42 = vpack.c.bf16 %v379_v41, %v379_v41 }
  0xd1   : > { %v717_v19 = vsel %vm689_vm4, %v716_v8, %v715_v25  ;;  %v596_v33 = vsel %vm401_vm1, %v567_v14, 0.0  ;;  %v657_v43 = vsel %vm401_vm1, %v628_v17, 0.0  ;;  %v585_v6 = vadd.f32 %v584_v34, %v583_v60 }
  0xd2   : > { %v455_v29 = vadd.f32 %v454_v26, %v453_v11  ;;  %v597_v45 = vadd.f32 %v596_v33, %v595_v46  ;;  %v658_v40 = vadd.f32 %v657_v43, %v656_v49  ;;  %v646_v48 = vadd.f32 %v645_v50, %v644_v28  ;;  %v668_v49 = vpop.permute.xlu1 %667 }
  0xd3   : > { %v693_v54 = vsel %vm692_vm5, %v691_v55, %v690_v21  ;;  %v536_v57 = vadd.f32 %v535_v24, %v534_v13  ;;  %v786_v31 = vunpack.c.l.b16 %v759_v42  ;;  %v637_v47 = vadd.f32 %v636_v62, %v635_v38 }
  0xd4   : > { %v456_v4 = vrot.slane %v455_v29, 1  ;;  %v598_v16 = vrot.slane %v597_v45, 4  ;;  %v659_v58 = vrot.slane %v658_v40, 4  ;;  %v654_v27 = vrot.slane %v653_v12, 1 }
  0xd5   : > { %v719_v2 = vsel %vm692_vm5, %v718_v30, %v717_v19  ;;  %v537_v46 = vrot.slane %v536_v57, 1  ;;  %v2595_v28 = vpack.c.b16 %v786_v31, %v785_v5  ;;  %v610_v56 = vadd.f32 %v2471_v63, %v585_v6 }
  0xd6   : > { %v457_v41 = vadd.f32 %v456_v4, %v455_v29  ;;  %v599_v60 = vadd.f32 %v598_v16, %v597_v45  ;;  %v660_v3 = vadd.f32 %v659_v58, %v658_v40  ;;  %v671_v55 = vadd.f32 %v668_v49, %v646_v48 }
  0xd7   : > { %v696_v39 = vsel %vm695_vm6, %v694_v20, %v693_v54  ;;  %v538_v38 = vadd.f32 %v537_v46, %v536_v57  ;;  %v721_v59 = vsel %vm695_vm6, %v720_v37, %v719_v2  ;;  %805 = vrot.lane.b32.xlu0 %v2595_v28, %s2274_s11  ;;  %v655_v5 = vadd.f32 %v654_v27, %v653_v12 }
  0xd8   : > { %v470_v30 = vadd.f32 %v2529_v22, %v457_v41  ;;  %v600_v36 = vrot.slane %v599_v60, 2  ;;  %v661_v1 = vrot.slane %v660_v3, 2  ;;  %v722_v15 = vrot.slane %v2577_v7, 2 }
  0xd9   : > { %v551_v35 = vadd.f32 %v2501_v52, %v538_v38  ;;  %v670_v20 = vadd.f32 %v668_v49, %v637_v47  ;;  %v731_v34 = vrot.slane %v610_v56, 7  ;;  %v699_v37 = vsel %vm698_vm7, %v697_v10, %v696_v39 }
  0xda   : > { %v601_v8 = vadd.f32 %v600_v36, %v599_v60  ;;  %v662_v9 = vadd.f32 %v661_v1, %v660_v3  ;;  %v700_v0 = vrot.slane %v470_v30, 1  ;;  %v723_v22 = vsel %vm698_vm7, %v722_v15, %v721_v59 }
  0xdb   : > { %v724_v62 = vrot.slane %v551_v35, 1  ;;  %v743_v11 = vrot.slane %v671_v55, 3  ;;  %v611_v7 = vadd.f32 %v2471_v63, %v2540_v51  ;;  %v672_v52 = vadd.f32 %v668_v49, %v655_v5 }
  0xdc   : > { %v602_v50 = vrot.slane %v601_v8, 1  ;;  %v663_v13 = vrot.slane %v662_v9, 1  ;;  %v702_v14 = vsel %vm701_vm8, %v700_v0, %v699_v37  ;;  %v742_v21 = vrot.slane %v670_v20, 4 }
  0xdd   : > { %v725_v17 = vsel %vm701_vm8, %v724_v62, %v723_v22  ;;  %v760_v12 = vpack.c.bf16 %v702_v14, %v702_v14  ;;  %v732_v10 = vsel %vm683_vm2, %v731_v34, %v2497_v44  ;;  %v733_v51 = vrot.slane %v611_v7, 6 }
  0xde   : > { %v603_v25 = vadd.f32 %v602_v50, %v601_v8  ;;  %v664_v26 = vadd.f32 %v663_v13, %v662_v9  ;;  %v761_v19 = vpack.c.bf16 %v725_v17, %v725_v17  ;;  %v744_v33 = vsel %vm695_vm6, %v743_v11, %v742_v21 }
  0xdf   : > { %v794_v24 = vunpack.c.l.b16 %v760_v12  ;;  %799 = vrot.lane.b32.xlu0 %v2480_v18, %s2274_s11  ;;  %v755_v40 = vpack.c.bf16 %v2512_v61, %v2512_v61  ;;  %v745_v42 = vrot.slane %v672_v52, 2  ;;  %v734_v44 = vsel %vm686_vm3, %v733_v51, %v732_v10 }
  0xe0   : > { %v612_v43 = vadd.f32 %v2471_v63, %v603_v25  ;;  %v673_v29 = vadd.f32 %v668_v49, %v664_v26  ;;  %v795_v45 = vunpack.c.l.b16 %v761_v19  ;;  %v754_v63 = vpack.c.bf16 %v2457_v23, %v2457_v23 }
  0xe1   : > { %v746_v57 = vsel %vm698_vm7, %v745_v42, %v744_v33  ;;  %v782_v58 = vunpack.c.l.b16 %v755_v40  ;;  %v757_v23 = vpack.c.bf16 %v2433_v53, %v2433_v53  ;;  %v756_v49 = vpack.c.bf16 %v2404_v32, %v2404_v32 }
  0xe2   : > { %v735_v6 = vrot.slane %v612_v43, 5  ;;  %v747_v48 = vrot.slane %v673_v29, 1  ;;  %v2623_v54 = vpack.c.b16 %v795_v45, %v794_v24  ;;  %v781_v47 = vunpack.c.l.b16 %v754_v63 }
  0xe3   : > { %v784_v41 = vunpack.c.l.b16 %v757_v23  ;;  %v783_v60 = vunpack.c.l.b16 %v756_v49 }
  0xe4   : > { %v736_v4 = vsel %vm689_vm4, %v735_v6, %v734_v44  ;;  %v748_v16 = vsel %vm701_vm8, %v747_v48, %v746_v57  ;;  %807 = vrot.lane.b32.xlu2 %v2623_v54, %s2274_s11  ;;  %v2638_v2 = vpack.c.b16 %v782_v58, %v781_v47 }
  0xe5   : > { %v751_v61 = vsel %vm750_vm9, %v736_v4, %v748_v16  ;;  %v2649_v3 = vpack.c.b16 %v784_v41, %v783_v60 }
  0xe6   : > { %v762_v31 = vpack.c.bf16 %v751_v61, %v751_v61 }
  0xe7   : > { %1039 = vrot.lane.b32.xlu0 %v2595_v28, %s2275_s15 }
  0xe8   : > { %v796_v27 = vunpack.c.l.b16 %v762_v31 }
  0xea   : > { %v2640_v46 = vpack.c.b16 %v796_v27, %v796_v27 }
  0xec   : > { %809 = vrot.lane.b32.xlu1 %v2640_v46, %s2274_s11  ;;  %801 = vrot.lane.b32.xlu2 %v2638_v2, %s2274_s11 }
  0xef   : > { %954 = vrot.lane.b32.xlu0 %v2595_v28, %s2276_s16 }
  0xf4   : > { %803 = vrot.lane.b32.xlu1 %v2649_v3, %s2274_s11  ;;  %1041 = vrot.lane.b32.xlu2 %v2623_v54, %s2275_s15  ;;  %s305_s11 = scalar_lea.vmem %s3327_s8, %s2038_s18 }
  0xf7   : > { %1273 = vrot.lane.b32.xlu0 %v2623_v54, %s2277_s17 }
  0xfc   : > { %1037 = vrot.lane.b32.xlu1 %v2649_v3, %s2275_s15  ;;  %1035 = vrot.lane.b32.xlu2 %v2638_v2, %s2275_s15 }
  0xff   : > { %1029 = vrot.lane.b32.xlu0 %v2649_v3, %s2278_s19 }
 0x104   : > { %1033 = vrot.lane.b32.xlu1 %v2480_v18, %s2275_s15  ;;  %956 = vrot.lane.b32.xlu2 %v2623_v54, %s2276_s16 }
 0x107   : > { %1031 = vrot.lane.b32.xlu0 %v2595_v28, %s2278_s19 }
 0x10c   : > { %1025 = vrot.lane.b32.xlu1 %v2480_v18, %s2278_s19  ;;  %1505 = vrot.lane.b32.xlu2 %v2623_v54, %s2279_s20 }
 0x10f   : > { %1489 = vrot.lane.b32.xlu0 %v2480_v18, %s2280_s21 }
 0x114   : > { %952 = vrot.lane.b32.xlu1 %v2649_v3, %s2276_s16  ;;  %1271 = vrot.lane.b32.xlu2 %v2595_v28, %s2277_s17 }
 0x117   : > { %1261 = vrot.lane.b32.xlu0 %v2649_v3, %s2281_s22 }
 0x11c   : > { %950 = vrot.lane.b32.xlu1 %v2638_v2, %s2276_s16  ;;  %1503 = vrot.lane.b32.xlu2 %v2595_v28, %s2279_s20 }
 0x11f   : > { %958 = vrot.lane.b32.xlu0 %v2640_v46, %s2276_s16 }
 0x124   : > { %948 = vrot.lane.b32.xlu1 %v2480_v18, %s2276_s16  ;;  %1499 = vrot.lane.b32.xlu2 %v2638_v2, %s2279_s20 }
 0x12c   : > { %1027 = vrot.lane.b32.xlu1 %v2638_v2, %s2278_s19  ;;  %1259 = vrot.lane.b32.xlu2 %v2638_v2, %s2281_s22 }
 0x134   : > { %1269 = vrot.lane.b32.xlu1 %v2649_v3, %s2277_s17  ;;  %1507 = vrot.lane.b32.xlu2 %v2640_v46, %s2279_s20 }
 0x13c   : > { %1501 = vrot.lane.b32.xlu1 %v2649_v3, %s2279_s20 }
 0x13e   : > { %v808_v59 = vpop.permute.xlu2 %807 }
 0x13f   : > { %v837_v36 = vsel %vm811_vm10, %v808_v59, 0 }
 0x144   : > { %1267 = vrot.lane.b32.xlu1 %v2638_v2, %s2277_s17 }
 0x146   : > { %v802_v9 = vpop.permute.xlu2 %801 }
 0x147   : > { %v828_v37 = vsel %vm811_vm10, %v802_v9, 0 }
 0x149   : > { %v806_v32 = vpop.permute.xlu0 %805 }
 0x14a   : > { %v834_v15 = vsel %vm811_vm10, %v806_v32, 0 }
 0x14c   : > { %1265 = vrot.lane.b32.xlu1 %v2480_v18, %s2277_s17 }
 0x14e   : > { %v1042_v62 = vpop.permute.xlu2 %1041 }
 0x14f   : > { %v1070_v44 = vsel %vm811_vm10, %v1042_v62, 0 }
 0x151   : > { %v800_v53 = vpop.permute.xlu0 %799 }
 0x152   : > { %v825_v50 = vsel %vm811_vm10, %v800_v53, 0 }
 0x154   : > { %1497 = vrot.lane.b32.xlu1 %v2480_v18, %s2279_s20 }
 0x156   : > { %v1036_v14 = vpop.permute.xlu2 %1035 }
 0x157   : > { %v1061_v47 = vsel %vm811_vm10, %v1036_v14, 0  ;;  %v2801_v14 = vld [vmem:[%s3324_s5 + $0x28] sm:$0xff] }
 0x159   : > { %v2692_v56 = vpop.permute.xlu0 %1039 }
 0x15a   : > { %v1067_v63 = vsel %vm811_vm10, %v2692_v56, 0 }
 0x15c   : > { %1257 = vrot.lane.b32.xlu1 %v2480_v18, %s2281_s22 }
 0x15e   : > { %v810_v55 = vpop.permute.xlu1 %809  ;;  %v957_v21 = vpop.permute.xlu2 %956 }
 0x15f   : > { %v840_v39 = vsel %vm811_vm10, %v810_v55, 0 }
 0x160   : > { %844 = vmatpush.bf16.xpose.msra.mxu1 %v840_v39 }
 0x161   : > { %v955_v38 = vpop.permute.xlu0 %954 }
 0x164   : > { %1491 = vrot.lane.b32.xlu1 %v2638_v2, %s2280_s21 }
 0x166   : > { %v804_v30 = vpop.permute.xlu1 %803  ;;  %v1506_v29 = vpop.permute.xlu2 %1505 }
 0x167   : > { %v831_v8 = vsel %vm811_vm10, %v804_v30, 0  ;;  %v1534_v56 = vsel %vm811_vm10, %v1506_v29, 0  ;;  %v2856_v29 = vld [vmem:[%s3324_s5] sm:$0xff] }
 0x168   : > { %845 = vmatpush.bf16.xpose.msra.mxu1 %v837_v36 }
 0x169   : > { %v2700_v1 = vpop.permute.xlu0 %1273 }
 0x16a   : > { %v1302_v4 = vsel %vm811_vm10, %v2700_v1, 0 }
 0x16c   : > { %1043 = vrot.lane.b32.xlu1 %v2640_v46, %s2275_s15  ;;  %s2282_s15 = smov 56  }
 0x16e   : > { %v2704_v5 = vpop.permute.xlu1 %1037  ;;  %v1272_v51 = vpop.permute.xlu2 %1271 }
 0x16f   : > { %v1064_v61 = vsel %vm811_vm10, %v2704_v5, 0  ;;  %v1299_v58 = vsel %vm811_vm10, %v1272_v51, 0  ;;  %v2779_v5 = vld [vmem:[%s3324_s5 + $0x18] sm:$0xff] }
 0x170   : > { %846 = vmatpush.bf16.xpose.msra.mxu1 %v834_v15 }
 0x171   : > { %v2707_v35 = vpop.permute.xlu0 %1029 }
 0x174   : > { %1275 = vrot.lane.b32.xlu1 %v2640_v46, %s2277_s17 }
 0x176   : > { %v2711_v20 = vpop.permute.xlu1 %1033  ;;  %v1504_v48 = vpop.permute.xlu2 %1503 }
 0x177   : > { %v1058_v49 = vsel %vm811_vm10, %v2711_v20, 0  ;;  %v1531_v39 = vsel %vm811_vm10, %v1504_v48, 0 }
 0x178   : > { %847 = vmatpush.bf16.xpose.msra.mxu1 %v831_v8 }
 0x179   : > { %v2714_v0 = vpop.permute.xlu0 %1031 }
 0x17e   : > { %v2716_v34 = vpop.permute.xlu1 %1025  ;;  %v1500_v16 = vpop.permute.xlu2 %1499 }
 0x17f   : > { %v1525_v9 = vsel %vm811_vm10, %v1500_v16, 0 }
 0x180   : > { %848 = vmatpush.bf16.xpose.msra.mxu1 %v828_v37 }
 0x181   : > { %v2719_v22 = vpop.permute.xlu0 %1489 }
 0x186   : > { %v953_v11 = vpop.permute.xlu1 %952  ;;  %v2749_v31 = vpop.permute.xlu2 %1259 }
 0x188   : > { %849 = vmatpush.bf16.xpose.msra.mxu1 %v825_v50 }
 0x189   : > { %v2722_v13 = vpop.permute.xlu0 %1261 }
 0x18e   : > { %v951_v7 = vpop.permute.xlu1 %950  ;;  %v1508_v23 = vpop.permute.xlu2 %1507 }
 0x18f   : > { %1992 = vmatmul.msk.bf16.vlgmr.msra.gmra.mxu1 %vm811_vm10, %v2480_v18  ;;  %v1537_v60 = vsel %vm811_vm10, %v1508_v23, 0 }
 0x191   : > { %v959_v52 = vpop.permute.xlu0 %958 }
 0x192   : > { %v978_v17 = vsel %vm750_vm9, %v959_v52, 0 }
 0x193   : > { %982 = vmatpush.bf16.msrb.mxu0 %v978_v17  ;;  %2046 = vmatpush.bf16.msra.mxu2 %v978_v17 }
 0x196   : > { %v949_v12 = vpop.permute.xlu1 %948 }
 0x197   : > { %983 = vmatpush.bf16.msrb.mxu0 %v957_v21  ;;  %2047 = vmatpush.bf16.msra.mxu2 %v957_v21 }
 0x19b   : > { %984 = vmatpush.bf16.msrb.mxu0 %v955_v38  ;;  %2048 = vmatpush.bf16.msra.mxu2 %v955_v38  ;;  %v2767_v38 = vld [vmem:[%s3324_s5 + $0x10] sm:$0xff] }
 0x19e   : > { %v1028_v25 = vpop.permute.xlu1 %1027 }
 0x19f   : > { %1993 = vmatmul.msk.bf16.gmra.mxu1 %vm811_vm10, %v2638_v2  ;;  %985 = vmatpush.bf16.msrb.mxu0 %v953_v11 }
 0x1a0   : > { %2049 = vmatpush.bf16.msra.mxu2 %v953_v11 }
 0x1a3   : > { %986 = vmatpush.bf16.msrb.mxu0 %v951_v7 }
 0x1a4   : > { %2050 = vmatpush.bf16.msra.mxu2 %v951_v7 }
 0x1a6   : > { %v1270_v26 = vpop.permute.xlu1 %1269 }
 0x1a7   : > { %987 = vmatpush.bf16.msrb.mxu0 %v949_v12  ;;  %v1296_v27 = vsel %vm811_vm10, %v1270_v26, 0  ;;  %v2820_v26 = vld [vmem:[%s3324_s5 + $0x38] sm:$0xff] }
 0x1a8   : > { %2051 = vmatpush.bf16.msra.mxu2 %v949_v12 }
 0x1ae   : > { %v1502_v19 = vpop.permute.xlu1 %1501 }
 0x1af   : > { %1994 = vmatmul.msk.bf16.gmra.mxu1 %vm811_vm10, %v2649_v3  ;;  %v1528_v1 = vsel %vm811_vm10, %v1502_v19, 0 }
 0x1b6   : > { %v1268_v10 = vpop.permute.xlu1 %1267 }
 0x1b7   : > { %v1293_v41 = vsel %vm811_vm10, %v1268_v10, 0 }
 0x1be   : > { %v1266_v24 = vpop.permute.xlu1 %1265 }
 0x1bf   : > { %1995 = vmatmul.msk.bf16.gmra.mxu1 %vm811_vm10, %v2595_v28  ;;  %v1290_v53 = vsel %vm811_vm10, %v1266_v24, 0 }
 0x1c6   : > { %v2733_v33 = vpop.permute.xlu1 %1497 }
 0x1c7   : > { %v1522_v50 = vsel %vm811_vm10, %v2733_v33, 0 }
 0x1ce   : > { %v2735_v43 = vpop.permute.xlu1 %1257 }
 0x1d6   : > { %v2737_v45 = vpop.permute.xlu1 %1491 }
 0x1de   : > { %v1044_v40 = vpop.permute.xlu1 %1043 }
 0x1df   : > { %v1073_v42 = vsel %vm811_vm10, %v1044_v40, 0 }
 0x1e0   : > { %1077 = vmatpush.bf16.xpose.msrb.mxu3 %v1073_v42 }
 0x1e6   : > { %v1276_v6 = vpop.permute.xlu1 %1275 }
 0x1e7   : > { %v1305_v57 = vsel %vm811_vm10, %v1276_v6, 0 }
 0x1e8   : > { %1078 = vmatpush.bf16.xpose.msrb.mxu3 %v1070_v44  ;;  %1309 = vmatpush.bf16.xpose.msrb.mxu2 %v1305_v57 }
 0x1f0   : > { %1079 = vmatpush.bf16.xpose.msrb.mxu3 %v1067_v63  ;;  %1310 = vmatpush.bf16.xpose.msrb.mxu2 %v1302_v4 }
 0x1f8   : > { %1080 = vmatpush.bf16.xpose.msrb.mxu3 %v1064_v61  ;;  %1311 = vmatpush.bf16.xpose.msrb.mxu2 %v1299_v58 }
 0x200   : > { %1081 = vmatpush.bf16.xpose.msrb.mxu3 %v1061_v47  ;;  %1312 = vmatpush.bf16.xpose.msrb.mxu2 %v1296_v27 }
 0x208   : > { %1082 = vmatpush.bf16.xpose.msrb.mxu3 %v1058_v49  ;;  %1313 = vmatpush.bf16.xpose.msrb.mxu2 %v1293_v41 }
 0x20c   : > { %v2757_v32 = vpop.f32.mrf.mxu1 }
 0x20f   : > { %2000 = vmatmul.msk.bf16.vlgmr.msrb.gmra.mxu3 %vm811_vm10, %v2716_v34  ;;  %v2787_v34 = vld [vmem:[%s3324_s5 + $0x20] sm:$0xff] }
 0x210   : > { %1541 = vmatpush.bf16.xpose.msra.mxu3 %v1537_v60  ;;  %1314 = vmatpush.bf16.xpose.msrb.mxu2 %v1290_v53 }
 0x214   : > { %v853_v55 = vpop.f32.mrf.mxu1 }
 0x218   : > { %1542 = vmatpush.bf16.xpose.msra.mxu3 %v1534_v56 }
 0x21c   : > { %v856_v59 = vpop.f32.mrf.mxu1 }
 0x21d   : > { %v2770_v30 = vadd.f32 %v856_v59, %v2767_v38 }
 0x21f   : > { %2001 = vmatmul.msk.bf16.gmra.mxu3 %vm811_vm10, %v1028_v25  ;;  %v878_v36 = vsel %vm871_vm11, %v2770_v30, -inf }
 0x220   : > { %1543 = vmatpush.bf16.xpose.msra.mxu3 %v1531_v39  ;;  %879 = vmax.xlane.f32.xlu2 %v878_v36 }
 0x224   : > { %v858_v15 = vpop.f32.mrf.mxu1 }
 0x225   : > { %v859_v20 = vadd.f32 %v858_v15, %v2779_v5 }
 0x227   : > { %v881_v8 = vsel %vm871_vm11, %v859_v20, -inf }
 0x228   : > { %1544 = vmatpush.bf16.xpose.msra.mxu3 %v1528_v1  ;;  %882 = vmax.xlane.f32.xlu0 %v881_v8 }
 0x22c   : > { %v861_v37 = vpop.f32.mrf.mxu1 }
 0x22d   : > { %v2790_v62 = vadd.f32 %v861_v37, %v2787_v34 }
 0x22f   : > { %2002 = vmatmul.msk.bf16.gmra.mxu3 %vm811_vm10, %v2707_v35  ;;  %v884_v11 = vsel %vm871_vm11, %v2790_v62, -inf  ;;  %v2808_v35 = vld [vmem:[%s3324_s5 + $0x30] sm:$0xff] }
 0x230   : > { %1545 = vmatpush.bf16.xpose.msra.mxu3 %v1525_v9  ;;  %885 = vmax.xlane.f32.xlu1 %v884_v11 }
 0x234   : > { %v863_v7 = vpop.f32.mrf.mxu1 }
 0x235   : > { %v864_v52 = vadd.f32 %v863_v7, %v2801_v14 }
 0x237   : > { %v887_v17 = vsel %vm871_vm11, %v864_v52, -inf }
 0x238   : > { %1546 = vmatpush.bf16.xpose.msra.mxu3 %v1522_v50  ;;  %888 = vmax.xlane.f32.xlu0 %v887_v17 }
 0x23c   : > { %v866_v12 = vpop.f32.mrf.mxu1 }
 0x23d   : > { %v2811_v21 = vadd.f32 %v866_v12, %v2808_v35 }
 0x23f   : > { %2003 = vmatmul.msk.bf16.gmra.mxu3 %vm811_vm10, %v2714_v0  ;;  %v890_v25 = vsel %vm871_vm11, %v2811_v21, -inf  ;;  %v2844_v0 = vld [vmem:[%s3324_s5 + $0x8] sm:$0xff] }
 0x240   : > { %891 = vmax.xlane.f32.xlu0 %v890_v25 }
 0x244   : > { %v868_v19 = vpop.f32.mrf.mxu1 }
 0x245   : > { %v2823_v10 = vadd.f32 %v868_v19, %v2820_v26 }
 0x247   : > { %v893_v24 = vsel %vm871_vm11, %v2823_v10, -inf }
 0x248   : > { %894 = vmax.xlane.f32.xlu2 %v893_v24 }
 0x249   : > { %1263 = vrot.lane.b32.xlu1 %v2595_v28, %s2281_s22  ;;  %s2284_s22 = smov 48  }
 0x24f   : > { %2016 = vmatmul.msk.bf16.vlgmr.msra.gmra.mxu3 %vm811_vm10, %v2719_v22  ;;  %v2849_v22 = vadd.f32 %v853_v55, %v2844_v0 }
 0x251   : > { %v875_v33 = vsel %vm871_vm11, %v2849_v22, -inf }
 0x254   : > { %1495 = vrot.lane.b32.xlu0 %v2595_v28, %s2280_s21 }
 0x25c   : > { %1190 = vrot.lane.b32.xlu0 %v2640_v46, %s2282_s15 }
 0x25f   : > { %2017 = vmatmul.msk.bf16.gmra.mxu3 %vm811_vm10, %v2737_v45  ;;  %v2860_v45 = vadd.f32 %v2757_v32, %v2856_v29 }
 0x260   : > { %1493 = vrot.lane.b32.xlu2 %v2649_v3, %s2280_s21  ;;  %s2283_s21 = smov 40  }
 0x261   : > { %v872_v51 = vsel %vm871_vm11, %v2860_v45, -inf }
 0x264   : > { %1188 = vrot.lane.b32.xlu0 %v2623_v54, %s2282_s15 }
 0x26c   : > { %1186 = vrot.lane.b32.xlu0 %v2595_v28, %s2282_s15 }
 0x273   : > { %876 = vmax.xlane.f32.xlu1 %v875_v33 }
 0x289   : > { %873 = vmax.xlane.f32.xlu2 %v872_v51 }
 0x28c   : > { %1184 = vrot.lane.b32.xlu1 %v2649_v3, %s2282_s15 }
 0x292   : > { %v1084_v40 = vpop.f32.mrf.mxu3 }
 0x293   : > { %v2867_v42 = vadd.f32 %v1084_v40, %v2856_v29  ;;  %v880_v6 = vpop.xlane.xlu2 %879 }
 0x294   : > { %v898_v44 = vsub.f32 %v2770_v30, %v880_v6 }
 0x295   : > { %v1104_v48 = vsel %vm871_vm11, %v2867_v42, -inf }
 0x296   : > { %1105 = vmax.xlane.f32.xlu0 %v1104_v48  ;;  %v908_v63 = vmul.f32 1.442695, %v898_v44 }
 0x298   : > { %2137 = vpow2.f32 %v908_v63 }
 0x29a   : > { %v1086_v57 = vpop.f32.mrf.mxu3 }
 0x29b   : > { %v2873_v4 = vadd.f32 %v1086_v57, %v2844_v0  ;;  %v883_v16 = vpop.xlane.xlu0 %882 }
 0x29c   : > { %v899_v61 = vsub.f32 %v859_v20, %v883_v16 }
 0x29d   : > { %v1107_v58 = vsel %vm871_vm11, %v2873_v4, -inf }
 0x29e   : > { %v910_v47 = vmul.f32 1.442695, %v899_v61  ;;  %1108 = vmax.xlane.f32.xlu2 %v1107_v58  ;;  %v2877_v49 = vpop.eup %2137 }
 0x2a0   : > { %2139 = vpow2.f32 %v910_v47 }
 0x2a2   : > { %v1089_v27 = vpop.f32.mrf.mxu3 }
 0x2a3   : > { %v886_v23 = vpop.xlane.xlu1 %885  ;;  %v2888_v30 = vadd.f32 %v1089_v27, %v2767_v38 }
 0x2a4   : > { %v900_v60 = vsub.f32 %v2790_v62, %v886_v23 }
 0x2a5   : > { %v1110_v20 = vsel %vm871_vm11, %v2888_v30, -inf }
 0x2a6   : > { %v2879_v41 = vpop.eup %2139  ;;  %v912_v56 = vmul.f32 1.442695, %v900_v60 }
 0x2a7   : > { %v945_v32 = vpack.c.bf16 %v2879_v41, %v2877_v49 }
 0x2a8   : > { %2141 = vpow2.f32 %v912_v56 }
 0x2a9   : > { %1997 = vmatmul.msk.bf16.vlgmr.msra.gmra.mxu2 %vm871_vm11, %v945_v32 }
 0x2aa   : > { %v1091_v53 = vpop.f32.mrf.mxu3  ;;  %1180 = vrot.lane.b32.xlu0 %v2480_v18, %s2282_s15 }
 0x2ab   : > { %v889_v55 = vpop.xlane.xlu0 %888  ;;  %v2928_v44 = vadd.f32 %v1091_v53, %v2779_v5 }
 0x2ac   : > { %v901_v39 = vsub.f32 %v864_v52, %v889_v55 }
 0x2ad   : > { %v1113_v63 = vsel %vm871_vm11, %v2928_v44, -inf }
 0x2ae   : > { %v914_v59 = vmul.f32 1.442695, %v901_v39  ;;  %v2890_v15 = vpop.eup %2141 }
 0x2b0   : > { %2143 = vpow2.f32 %v914_v59 }
 0x2b2   : > { %v1094_v36 = vpop.f32.mrf.mxu3 }
 0x2b3   : > { %v892_v1 = vpop.xlane.xlu0 %891  ;;  %v2917_v51 = vadd.f32 %v1094_v36, %v2787_v34 }
 0x2b4   : > { %v902_v9 = vsub.f32 %v2811_v21, %v892_v1 }
 0x2b5   : > { %v1116_v6 = vsel %vm871_vm11, %v2917_v51, -inf }
 0x2b6   : > { %v2894_v8 = vpop.eup %2143  ;;  %1111 = vmax.xlane.f32.xlu1 %v1110_v20  ;;  %1182 = vrot.lane.b32.xlu2 %v2638_v2, %s2282_s15  ;;  %v916_v11 = vmul.f32 1.442695, %v902_v9 }
 0x2b7   : > { %v946_v37 = vpack.c.bf16 %v2894_v8, %v2890_v15 }
 0x2b8   : > { %2145 = vpow2.f32 %v916_v11 }
 0x2b9   : > { %1998 = vmatmul.msk.bf16.gmra.mxu2 %vm871_vm11, %v946_v37 }
 0x2ba   : > { %v1096_v62 = vpop.f32.mrf.mxu3 }
 0x2bb   : > { %v2903_v50 = vadd.f32 %v1096_v62, %v2801_v14  ;;  %v895_v7 = vpop.xlane.xlu2 %894 }
 0x2bc   : > { %v903_v52 = vsub.f32 %v2823_v10, %v895_v7 }
 0x2bd   : > { %v1119_v17 = vsel %vm871_vm11, %v2903_v50, -inf }
 0x2be   : > { %v918_v12 = vmul.f32 1.442695, %v903_v52  ;;  %1120 = vmax.xlane.f32.xlu1 %v1119_v17  ;;  %v2909_v25 = vpop.eup %2145 }
 0x2c0   : > { %2147 = vpow2.f32 %v918_v12 }
 0x2c2   : > { %v1099_v16 = vpop.f32.mrf.mxu3 }
 0x2c3   : > { %v1494_v21 = vpop.permute.xlu2 %1493  ;;  %v2935_v61 = vadd.f32 %v1099_v16, %v2808_v35 }
 0x2c4   : > { %2018 = vmatmul.msk.bf16.gmra.mxu3 %vm811_vm10, %v1494_v21 }
 0x2c5   : > { %v1122_v58 = vsel %vm871_vm11, %v2935_v61, -inf }
 0x2c6   : > { %v2911_v19 = vpop.eup %2147  ;;  %v1496_v24 = vpop.permute.xlu0 %1495 }
 0x2c7   : > { %v947_v33 = vpack.c.bf16 %v2911_v19, %v2909_v25 }
 0x2c9   : > { %1999 = vmatmul.msk.bf16.gmra.mxu2 %vm871_vm11, %v947_v33 }
 0x2ca   : > { %v1101_v32 = vpop.f32.mrf.mxu3 }
 0x2ce   : > { %v1191_v10 = vpop.permute.xlu0 %1190 }
 0x2cf   : > { %v1210_v40 = vsel %vm750_vm9, %v1191_v10, 0 }
 0x2d0   : > { %1214 = vmatpush.bf16.msra.mxu0 %v1210_v40 }
 0x2d4   : > { %1117 = vmax.xlane.f32.xlu0 %v1116_v6  ;;  %2019 = vmatmul.msk.bf16.gmra.mxu3 %vm811_vm10, %v1496_v24 }
 0x2d6   : > { %v1189_v48 = vpop.permute.xlu0 %1188 }
 0x2d7   : > { %1654 = vrot.lane.b32.xlu1 %v2640_v46, %s2283_s21  ;;  %1215 = vmatpush.bf16.msra.mxu0 %v1189_v48 }
 0x2d9   : > { %2008 = vmatmul.msk.bf16.vlgmr.msrb.gmra.mxu2 %vm811_vm10, %v2735_v43  ;;  %v1264_v43 = vpop.permute.xlu1 %1263 }
 0x2de   : > { %v1187_v57 = vpop.permute.xlu0 %1186 }
 0x2df   : > { %1648 = vrot.lane.b32.xlu1 %v2649_v3, %s2283_s21  ;;  %1114 = vmax.xlane.f32.xlu2 %v1113_v63 }
 0x2e0   : > { %1216 = vmatpush.bf16.msra.mxu0 %v1187_v57 }
 0x2e6   : > { %v877_v47 = vpop.xlane.xlu1 %876 }
 0x2e7   : > { %1412 = vrot.lane.b32.xlu1 %v2480_v18, %s2284_s22  ;;  %1123 = vmax.xlane.f32.xlu2 %v1122_v58  ;;  %v897_v27 = vsub.f32 %v2849_v22, %v877_v47 }
 0x2e8   : > { %1420 = vrot.lane.b32.xlu0 %v2623_v54, %s2284_s22 }
 0x2e9   : > { %2009 = vmatmul.msk.bf16.gmra.mxu2 %vm811_vm10, %v2749_v31  ;;  %v906_v23 = vmul.f32 1.442695, %v897_v27 }
 0x2eb   : > { %2149 = vpow2.f32 %v906_v23 }
 0x2f0   : > { %1418 = vrot.lane.b32.xlu0 %v2595_v28, %s2284_s22 }
 0x2f8   : > { %1650 = vrot.lane.b32.xlu0 %v2595_v28, %s2283_s21  ;;  %v2957_v28 = vpop.eup %2149 }
 0x2f9   : > { %2010 = vmatmul.msk.bf16.gmra.mxu2 %vm811_vm10, %v2722_v13  ;;  %v1548_v13 = vpop.f32.mrf.mxu3 }
 0x2fa   : > { %v2993_v52 = vadd.f32 %v1548_v13, %v2856_v29 }
 0x2fc   : > { %v874_v60 = vpop.xlane.xlu2 %873  ;;  %v1568_v17 = vsel %vm871_vm11, %v2993_v52, -inf }
 0x2fd   : > { %v896_v53 = vsub.f32 %v2860_v45, %v874_v60 }
 0x2fe   : > { %v1185_v56 = vpop.permute.xlu1 %1184 }
 0x2ff   : > { %v904_v31 = vmul.f32 1.442695, %v896_v53  ;;  %1422 = vrot.lane.b32.xlu2 %v2640_v46, %s2284_s22  ;;  %1217 = vmatpush.bf16.msra.mxu0 %v1185_v56  ;;  %v2968_v46 = vadd.f32 %v1101_v32, %v2820_v26 }
 0x300   : > { %1414 = vrot.lane.b32.xlu0 %v2638_v2, %s2284_s22 }
 0x301   : > { %2151 = vpow2.f32 %v904_v31  ;;  %v1125_v59 = vsel %vm871_vm11, %v2968_v46, -inf }
 0x307   : > { %v2959_v22 = vpop.eup %2151  ;;  %1652 = vrot.lane.b32.xlu2 %v2623_v54, %s2283_s21  ;;  %v1550_v54 = vpop.f32.mrf.mxu3 }
 0x308   : > { %v944_v45 = vpack.c.bf16 %v2957_v28, %v2959_v22  ;;  %v2977_v20 = vadd.f32 %v1550_v54, %v2844_v0 }
 0x309   : > { %2011 = vmatmul.msk.bf16.gmra.mxu2 %vm811_vm10, %v1264_v43  ;;  %v1106_v55 = vpop.xlane.xlu0 %1105 }
 0x30a   : > { %1996 = vmatmul.msk.bf16.vlgmr.msrb.gmra.mxu0 %vm871_vm11, %v944_v45  ;;  %v1128_v39 = vsub.f32 %v2867_v42, %v1106_v55 }
 0x30c   : > { %v1136_v9 = vmul.f32 1.442695, %v1128_v39 }
 0x30f   : > { %1416 = vrot.lane.b32.xlu2 %v2649_v3, %s2284_s22  ;;  %v1571_v3 = vsel %vm871_vm11, %v2977_v20, -inf }
 0x311   : > { %1126 = vmax.xlane.f32.xlu1 %v1125_v59  ;;  %v1109_v36 = vpop.xlane.xlu2 %1108 }
 0x312   : > { %v1129_v1 = vsub.f32 %v2873_v4, %v1109_v36 }
 0x314   : > { %v1138_v37 = vmul.f32 1.442695, %v1129_v1 }
 0x316   : > { %2153 = vpow2.f32 %v1138_v37 }
 0x317   : > { %1646 = vrot.lane.b32.xlu2 %v2638_v2, %s2283_s21  ;;  %2155 = vpow2.f32 %v1136_v9  ;;  %v1553_v2 = vpop.f32.mrf.mxu3 }
 0x318   : > { %v3009_v48 = vadd.f32 %v1553_v2, %v2767_v38 }
 0x319   : > { %1572 = vmax.xlane.f32.xlu1 %v1571_v3  ;;  %v1183_v42 = vpop.permute.xlu2 %1182 }
 0x31a   : > { %1218 = vmatpush.bf16.msra.mxu0 %v1183_v42  ;;  %v1574_v16 = vsel %vm871_vm11, %v3009_v48, -inf }
 0x31c   : > { %v2983_v62 = vpop.eup %2153  ;;  %v1181_v11 = vpop.permute.xlu0 %1180 }
 0x31d   : > { %v2985_v4 = vpop.eup %2155 }
 0x31e   : > { %1219 = vmatpush.bf16.msra.mxu0 %v1181_v11  ;;  %v1176_v7 = vpack.c.bf16 %v2983_v62, %v2985_v4 }
 0x31f   : > { %1644 = vrot.lane.b32.xlu2 %v2480_v18, %s2283_s21  ;;  %v1555_v12 = vpop.f32.mrf.mxu3 }
 0x320   : > { %v3000_v24 = vadd.f32 %v1555_v12, %v2779_v5 }
 0x321   : > { %2004 = vmatmul.msk.bf16.vlgmr.msra.gmra.mxu0 %vm871_vm11, %v1176_v7 }
 0x322   : > { %v1577_v33 = vsel %vm871_vm11, %v3000_v24, -inf }
 0x329   : > { %v1112_v10 = vpop.xlane.xlu1 %1111 }
 0x32a   : > { %1569 = vmax.xlane.f32.xlu0 %v1568_v17  ;;  %v1130_v60 = vsub.f32 %v2888_v30, %v1112_v10 }
 0x32c   : > { %v2997_v21 = vpop.f32.mrf.mxu2  ;;  %v1140_v56 = vmul.f32 1.442695, %v1130_v60 }
 0x32e   : > { %2157 = vpow2.f32 %v1140_v56 }
 0x331   : > { %v1121_v6 = vpop.xlane.xlu1 %1120 }
 0x332   : > { %1578 = vmax.xlane.f32.xlu0 %v1577_v33  ;;  %v1133_v2 = vsub.f32 %v2903_v50, %v1121_v6 }
 0x334   : > { %v3004_v18 = vpop.f32.mrf.mxu2  ;;  %v2158_v37 = vpop.eup %2157 }
 0x33c   : > { %v3006_v40 = vpop.f32.mrf.mxu2 }
 0x344   : > { %v3011_v57 = vpop.f32.mrf.mxu2 }
 0x347   : > { %v1558_v63 = vpop.f32.mrf.mxu3  ;;  %v1118_v31 = vpop.xlane.xlu0 %1117 }
 0x348   : > { %v3016_v58 = vadd.f32 %v1558_v63, %v2787_v34  ;;  %1575 = vmax.xlane.f32.xlu2 %v1574_v16  ;;  %v1132_v42 = vsub.f32 %v2917_v51, %v1118_v31  ;;  %v1146_v16 = vmul.f32 1.442695, %v1133_v2 }
 0x349   : > { %v1655_v43 = vpop.permute.xlu1 %1654 }
 0x34a   : > { %v1674_v47 = vsel %vm750_vm9, %v1655_v43, 0  ;;  %v1580_v27 = vsel %vm871_vm11, %v3016_v58, -inf  ;;  %v1144_v17 = vmul.f32 1.442695, %v1132_v42 }
 0x34b   : > { %1581 = vmax.xlane.f32.xlu0 %v1580_v27  ;;  %1678 = vmatpush.bf16.msrb.mxu0 %v1674_v47  ;;  %v1155_v47 = vsel %vm871_vm11, %v2983_v62, 0.0 }
 0x34c   : > { %v3021_v23 = vpop.f32.mrf.mxu2 }
 0x34f   : > { %v1560_v32 = vpop.f32.mrf.mxu3 }
 0x350   : > { %v3025_v53 = vadd.f32 %v1560_v32, %v2801_v14 }
 0x352   : > { %v1115_v13 = vpop.xlane.xlu2 %1114  ;;  %v1583_v45 = vsel %vm871_vm11, %v3025_v53, -inf }
 0x353   : > { %v1131_v55 = vsub.f32 %v2928_v44, %v1115_v13  ;;  %1584 = vmax.xlane.f32.xlu1 %v1583_v45 }
 0x354   : > { %v3030_v39 = vpop.f32.mrf.mxu2 }
 0x355   : > { %v1142_v59 = vmul.f32 1.442695, %v1131_v55  ;;  %v1649_v55 = vpop.permute.xlu1 %1648 }
 0x357   : > { %2159 = vpow2.f32 %v1142_v59  ;;  %v1563_v54 = vpop.f32.mrf.mxu3 }
 0x358   : > { %v3033_v30 = vadd.f32 %v1563_v54, %v2808_v35  ;;  %2161 = vpow2.f32 %v1144_v17 }
 0x359   : > { %2163 = vpow2.f32 %v1146_v16 }
 0x35a   : > { %v1421_v36 = vpop.permute.xlu0 %1420  ;;  %v3035_v1 = vpop.xlane.xlu2 %1123  ;;  %v1586_v9 = vsel %vm871_vm11, %v3033_v30, -inf }
 0x35b   : > { %1587 = vmax.xlane.f32.xlu1 %v1586_v9  ;;  %v1134_v2 = vsub.f32 %v2935_v61, %v3035_v1 }
 0x35c   : > { %v1316_v3 = vpop.f32.mrf.mxu2 }
 0x35d   : > { %v3039_v44 = vpop.eup %2159  ;;  %v3043_v11 = vadd.f32 %v1316_v3, %v2856_v29  ;;  %v1413_v9 = vpop.permute.xlu1 %1412 }
 0x35e   : > { %v1177_v7 = vpack.c.bf16 %v3039_v44, %v2158_v37  ;;  %v2162_v60 = vpop.eup %2161 }
 0x35f   : > { %v1336_v10 = vsel %vm871_vm11, %v3043_v11, -inf  ;;  %v1565_v6 = vpop.f32.mrf.mxu3  ;;  %v3064_v31 = vpop.eup %2163  ;;  %v1164_v16 = vsel %vm871_vm11, %v2162_v60, 0.0 }
 0x360   : > { %2005 = vmatmul.msk.bf16.gmra.mxu0 %vm871_vm11, %v1177_v7  ;;  %v3059_v27 = vadd.f32 %v1565_v6, %v2820_v26  ;;  %v1178_v45 = vpack.c.bf16 %v3064_v31, %v2162_v60  ;;  %v1158_v7 = vsel %vm871_vm11, %v2158_v37, 0.0 }
 0x362   : > { %v1419_v12 = vpop.permute.xlu0 %1418  ;;  %v1423_v33 = vpop.permute.xlu2 %1422  ;;  %v1589_v13 = vsel %vm871_vm11, %v3059_v27, -inf }
 0x363   : > { %1337 = vmax.xlane.f32.xlu1 %v1336_v10  ;;  %v1442_v63 = vsel %vm750_vm9, %v1423_v33, 0 }
 0x364   : > { %v1318_v51 = vpop.f32.mrf.mxu2  ;;  %1446 = vmatpush.bf16.msrb.mxu1 %v1442_v63 }
 0x365   : > { %v3052_v29 = vadd.f32 %v1318_v51, %v2844_v0 }
 0x367   : > { %v1339_v50 = vsel %vm871_vm11, %v3052_v29, -inf }
 0x368   : > { %1340 = vmax.xlane.f32.xlu2 %v1339_v50  ;;  %1447 = vmatpush.bf16.msrb.mxu1 %v1421_v36  ;;  %v1152_v36 = vsel %vm871_vm11, %v2985_v4, 0.0 }
 0x36a   : > { %v1653_v43 = vpop.permute.xlu2 %1652  ;;  %v1651_v0 = vpop.permute.xlu0 %1650 }
 0x36b   : > { %1156 = vadd.xlane.f32.xlu1 %v1155_v47  ;;  %1679 = vmatpush.bf16.msrb.mxu0 %v1653_v43 }
 0x36c   : > { %v1321_v32 = vpop.f32.mrf.mxu2  ;;  %1448 = vmatpush.bf16.msrb.mxu1 %v1419_v12  ;;  %v1148_v12 = vmul.f32 1.442695, %v1134_v2 }
 0x36d   : > { %v3062_v56 = vadd.f32 %v1321_v32, %v2767_v38 }
 0x36e   : > { %2165 = vpow2.f32 %v1148_v12 }
 0x36f   : > { %1680 = vmatpush.bf16.msrb.mxu0 %v1651_v0  ;;  %v1342_v62 = vsel %vm871_vm11, %v3062_v56, -inf }
 0x370   : > { %1590 = vmax.xlane.f32.xlu2 %v1589_v13  ;;  %1343 = vmax.xlane.f32.xlu0 %v1342_v62  ;;  %v920_v62 = vsel %vm871_vm11, %v2959_v22, 0.0 }
 0x371   : > { %2006 = vmatmul.msk.bf16.gmra.mxu0 %vm871_vm11, %v1178_v45 }
 0x372   : > { %v1417_v59 = vpop.permute.xlu2 %1416  ;;  %v1415_v54 = vpop.permute.xlu0 %1414 }
 0x373   : > { %1449 = vmatpush.bf16.msrb.mxu1 %v1417_v59  ;;  %1681 = vmatpush.bf16.msrb.mxu0 %v1649_v55 }
 0x374   : > { %v3072_v38 = vpop.f32.mrf.mxu2  ;;  %v3086_v61 = vpop.eup %2165 }
 0x377   : > { %1450 = vmatpush.bf16.msrb.mxu1 %v1415_v54 }
 0x378   : > { %1153 = vadd.xlane.f32.xlu0 %v1152_v36 }
 0x37a   : > { %v1647_v3 = vpop.permute.xlu2 %1646 }
 0x37b   : > { %1451 = vmatpush.bf16.msrb.mxu1 %v1413_v9  ;;  %1682 = vmatpush.bf16.msrb.mxu0 %v1647_v3 }
 0x37c   : > { %v3076_v42 = vpop.f32.mrf.mxu2 }
 0x380   : > { %1159 = vadd.xlane.f32.xlu0 %v1158_v7  ;;  %v1161_v7 = vsel %vm871_vm11, %v3039_v44, 0.0 }
 0x382   : > { %v1645_v17 = vpop.permute.xlu2 %1644 }
 0x383   : > { %1683 = vmatpush.bf16.msrb.mxu0 %v1645_v17 }
 0x384   : > { %v1127_v33 = vpop.xlane.xlu1 %1126  ;;  %v1328_v10 = vpop.f32.mrf.mxu2 }
 0x385   : > { %v1135_v4 = vsub.f32 %v2968_v46, %v1127_v33 }
 0x387   : > { %v1150_v63 = vmul.f32 1.442695, %v1135_v4 }
 0x388   : > { %1165 = vadd.xlane.f32.xlu0 %v1164_v16 }
 0x389   : > { %2167 = vpow2.f32 %v1150_v63 }
 0x38c   : > { %v1573_v51 = vpop.xlane.xlu1 %1572  ;;  %v3083_v50 = vpop.f32.mrf.mxu2 }
 0x38d   : > { %v1593_v37 = vsub.f32 %v2977_v20, %v1573_v51 }
 0x38f   : > { %v2168_v1 = vpop.eup %2167  ;;  %v1602_v6 = vmul.f32 1.442695, %v1593_v37 }
 0x390   : > { %v1179_v43 = vpack.c.bf16 %v2168_v1, %v3086_v61  ;;  %v1173_v59 = vsel %vm871_vm11, %v2168_v1, 0.0 }
 0x391   : > { %2169 = vpow2.f32 %v1602_v6  ;;  %v3116_v6 = vpop.f32.mrf.mxu0 }
 0x392   : > { %2007 = vmatmul.msk.bf16.gmra.mxu0 %vm871_vm11, %v1179_v43  ;;  %v1167_v43 = vsel %vm871_vm11, %v3064_v31, 0.0 }
 0x394   : > { %v1333_v46 = vpop.f32.mrf.mxu2 }
 0x395   : > { %v3091_v47 = vadd.f32 %v1333_v46, %v2820_v26 }
 0x397   : > { %v2170_v60 = vpop.eup %2169  ;;  %v1357_v0 = vsel %vm871_vm11, %v3091_v47, -inf }
 0x398   : > { %1358 = vmax.xlane.f32.xlu0 %v1357_v0  ;;  %v1619_v20 = vsel %vm871_vm11, %v2170_v60, 0.0 }
 0x399   : > { %1620 = vadd.xlane.f32.xlu2 %v1619_v20  ;;  %v3125_v0 = vpop.f32.mrf.mxu0 }
 0x39d   : > { %v1570_v32 = vpop.xlane.xlu0 %1569 }
 0x39e   : > { %v1592_v13 = vsub.f32 %v2993_v52, %v1570_v32 }
 0x3a0   : > { %v1600_v45 = vmul.f32 1.442695, %v1592_v13  ;;  %921 = vadd.xlane.f32.xlu0 %v920_v62 }
 0x3a2   : > { %2171 = vpow2.f32 %v1600_v45  ;;  %v3134_v45 = vadd.f32 %v3072_v38, %v2779_v5  ;;  %v3144_v5 = vadd.f32 %v3076_v42, %v2787_v34 }
 0x3a5   : > { %v1579_v55 = vpop.xlane.xlu0 %1578 }
 0x3a6   : > { %v1595_v26 = vsub.f32 %v3000_v24, %v1579_v55  ;;  %v3107_v24 = vadd.f32 %v1328_v10, %v2801_v14 }
 0x3a8   : > { %v2172_v54 = vpop.eup %2171  ;;  %v1606_v36 = vmul.f32 1.442695, %v1595_v26  ;;  %1174 = vadd.xlane.f32.xlu0 %v1173_v59  ;;  %v1351_v2 = vsel %vm871_vm11, %v3107_v24, -inf  ;;  %v1221_v26 = vpop.f32.mrf.mxu0  ;;  %v1345_v59 = vsel %vm871_vm11, %v3134_v45, -inf }
 0x3a9   : > { %v1640_v9 = vpack.c.bf16 %v2170_v60, %v2172_v54  ;;  %v1616_v3 = vsel %vm871_vm11, %v2172_v54, 0.0  ;;  %v3123_v60 = vadd.f32 %v3083_v50, %v2808_v35 }
 0x3aa   : > { %2173 = vpow2.f32 %v1606_v36  ;;  %1617 = vadd.xlane.f32.xlu1 %v1616_v3  ;;  %v1170_v36 = vsel %vm871_vm11, %v3086_v61, 0.0 }
 0x3ab   : > { %2020 = vmatmul.msk.bf16.vlgmr.msrb.gmra.mxu0 %vm871_vm11, %v1640_v9  ;;  %v1354_v31 = vsel %vm871_vm11, %v3123_v60, -inf }
 0x3b0   : > { %v2174_v52 = vpop.eup %2173 }
 0x3b1   : > { %v1625_v22 = vsel %vm871_vm11, %v2174_v52, 0.0 }
 0x3b2   : > { %1626 = vadd.xlane.f32.xlu2 %v1625_v22  ;;  %1162 = vadd.xlane.f32.xlu1 %v1161_v7 }
 0x3ba   : > { %1352 = vmax.xlane.f32.xlu2 %v1351_v2  ;;  %v1348_v2 = vsel %vm871_vm11, %v3144_v5, -inf }
 0x3bb   : > { %v1576_v17 = vpop.xlane.xlu2 %1575 }
 0x3bc   : > { %v1594_v12 = vsub.f32 %v3009_v48, %v1576_v17  ;;  %v1223_v17 = vpop.f32.mrf.mxu0 }
 0x3be   : > { %v1604_v33 = vmul.f32 1.442695, %v1594_v12  ;;  %v1582_v4 = vpop.xlane.xlu0 %1581  ;;  %v923_v12 = vsel %vm871_vm11, %v2957_v28, 0.0 }
 0x3bf   : > { %v1596_v16 = vsub.f32 %v3016_v58, %v1582_v4 }
 0x3c0   : > { %2175 = vpow2.f32 %v1604_v33 }
 0x3c1   : > { %v1608_v1 = vmul.f32 1.442695, %v1596_v16 }
 0x3c6   : > { %v2176_v63 = vpop.eup %2175  ;;  %v1585_v51 = vpop.xlane.xlu1 %1584 }
 0x3c7   : > { %v1597_v44 = vsub.f32 %v3025_v53, %v1585_v51  ;;  %v1622_v37 = vsel %vm871_vm11, %v2176_v63, 0.0  ;;  %v1641_v14 = vpack.c.bf16 %v2174_v52, %v2176_v63 }
 0x3c8   : > { %1623 = vadd.xlane.f32.xlu1 %v1622_v37 }
 0x3c9   : > { %v1610_v10 = vmul.f32 1.442695, %v1597_v44  ;;  %2021 = vmatmul.msk.bf16.gmra.mxu0 %vm871_vm11, %v1641_v14 }
 0x3cb   : > { %2177 = vpow2.f32 %v1610_v10 }
 0x3cc   : > { %2179 = vpow2.f32 %v1608_v1 }
 0x3ce   : > { %v1588_v48 = vpop.xlane.xlu1 %1587 }
 0x3cf   : > { %v1598_v54 = vsub.f32 %v3033_v30, %v1588_v48 }
 0x3d0   : > { %1168 = vadd.xlane.f32.xlu1 %v1167_v43 }
 0x3d1   : > { %v2178_v58 = vpop.eup %2177  ;;  %v1612_v9 = vmul.f32 1.442695, %v1598_v54 }
 0x3d2   : > { %v1631_v53 = vsel %vm871_vm11, %v2178_v58, 0.0  ;;  %v2180_v46 = vpop.eup %2179 }
 0x3d3   : > { %1632 = vadd.xlane.f32.xlu2 %v1631_v53  ;;  %v1628_v13 = vsel %vm871_vm11, %v2180_v46, 0.0  ;;  %v1642_v62 = vpack.c.bf16 %v2178_v58, %v2180_v46  ;;  %v926_v46 = vsel %vm871_vm11, %v2877_v49, 0.0 }
 0x3d6   : > { %v1338_v20 = vpop.xlane.xlu1 %1337 }
 0x3d7   : > { %v1360_v32 = vsub.f32 %v3043_v11, %v1338_v20 }
 0x3d8   : > { %1629 = vadd.xlane.f32.xlu1 %v1628_v13 }
 0x3d9   : > { %2022 = vmatmul.msk.bf16.gmra.mxu0 %vm871_vm11, %v1642_v62  ;;  %v1368_v35 = vmul.f32 1.442695, %v1360_v32 }
 0x3db   : > { %1355 = vmax.xlane.f32.xlu2 %v1354_v31  ;;  %v1341_v50 = vpop.xlane.xlu2 %1340  ;;  %2181 = vpow2.f32 %v1368_v35  ;;  %v932_v31 = vsel %vm871_vm11, %v2890_v15, 0.0 }
 0x3dc   : > { %v1361_v55 = vsub.f32 %v3052_v29, %v1341_v50 }
 0x3dd   : > { %v1226_v4 = vpop.f32.mrf.mxu0 }
 0x3de   : > { %v1370_v11 = vmul.f32 1.442695, %v1361_v55  ;;  %v1157_v7 = vpop.xlane.xlu1 %1156 }
 0x3e0   : > { %2183 = vpow2.f32 %v1370_v11  ;;  %1346 = vmax.xlane.f32.xlu1 %v1345_v59 }
 0x3e1   : > { %v3149_v52 = vpop.eup %2181  ;;  %2185 = vpow2.f32 %v1612_v9 }
 0x3e3   : > { %v3146_v38 = vpop.xlane.xlu0 %1343  ;;  %1171 = vadd.xlane.f32.xlu2 %v1170_v36  ;;  %v1591_v29 = vpop.xlane.xlu2 %1590 }
 0x3e4   : > { %v1599_v3 = vsub.f32 %v3059_v27, %v1591_v29 }
 0x3e5   : > { %v1228_v28 = vpop.f32.mrf.mxu0 }
 0x3e6   : > { %v2184_v22 = vpop.eup %2183  ;;  %v1614_v30 = vmul.f32 1.442695, %v1599_v3 }
 0x3e7   : > { %v1408_v61 = vpack.c.bf16 %v2184_v22, %v3149_v52  ;;  %v2186_v27 = vpop.eup %2185  ;;  %v1387_v36 = vsel %vm871_vm11, %v2184_v22, 0.0 }
 0x3e8   : > { %1349 = vmax.xlane.f32.xlu1 %v1348_v2  ;;  %2187 = vpow2.f32 %v1614_v30  ;;  %v1634_v10 = vsel %vm871_vm11, %v2186_v27, 0.0 }
 0x3e9   : > { %2012 = vmatmul.msk.bf16.vlgmr.msrb.gmra.mxu1 %vm871_vm11, %v1408_v61  ;;  %2189 = vrcp.f32 %v1157_v7 }
 0x3eb   : > { %v1154_v34 = vpop.xlane.xlu0 %1153 }
 0x3ec   : > { %2191 = vrcp.f32 %v1154_v34 }
 0x3ee   : > { %v2188_v42 = vpop.eup %2187  ;;  %v1231_v1 = vpop.f32.mrf.mxu0 }
 0x3ef   : > { %v2190_v33 = vpop.eup %2189  ;;  %v1637_v63 = vsel %vm871_vm11, %v2188_v42, 0.0  ;;  %v1643_v16 = vpack.c.bf16 %v2188_v42, %v2186_v27 }
 0x3f0   : > { %924 = vadd.xlane.f32.xlu1 %v923_v12  ;;  %1638 = vadd.xlane.f32.xlu2 %v1637_v63  ;;  %v1250_v37 = vmul.f32 %v2190_v33, %v1223_v17 }
 0x3f1   : > { %2023 = vmatmul.msk.bf16.gmra.mxu0 %vm871_vm11, %v1643_v16 }
 0x3f2   : > { %v2192_v51 = vpop.eup %2191 }
 0x3f3   : > { %v1249_v44 = vmul.f32 %v2192_v51, %v1221_v26  ;;  %v1160_v20 = vpop.xlane.xlu0 %1159 }
 0x3f4   : > { %2193 = vrcp.f32 %v1160_v20 }
 0x3f5   : > { %v2075_v14 = vpack.i.bf16 %v1250_v37, %v1249_v44  ;;  %v1362_v37 = vsub.f32 %v3062_v56, %v3146_v38 }
 0x3f6   : > { %v1233_v48 = vpop.f32.mrf.mxu0 }
 0x3f7   : > { %2076 = vrot.lane.b32.xlu0 %v2075_v14, %s2285_s23  ;;  %v1372_v20 = vmul.f32 1.442695, %v1362_v37 }
 0x3f8   : > { %1635 = vadd.xlane.f32.xlu1 %v1634_v10 }
 0x3fa   : > { %v2194_v35 = vpop.eup %2193 }
 0x3fb   : > { %v1251_v55 = vmul.f32 %v2194_v35, %v1226_v4  ;;  %v1166_v30 = vpop.xlane.xlu0 %1165 }
 0x40b   : > { %v3172_v2 = vpop.xlane.xlu0 %1358 }
 0x40c   : > { %v1621_v13 = vpop.xlane.xlu2 %1620 }
 0x40f   : > { %v3161_v43 = vpop.f32.mrf.mxu0 }
 0x413   : > { %v922_v42 = vpop.xlane.xlu0 %921 }
 0x417   : > { %v3163_v53 = vpop.f32.mrf.mxu0 }
 0x41d   : > { %v1618_v58 = vpop.xlane.xlu1 %1617 }
 0x421   : > { %927 = vadd.xlane.f32.xlu0 %v926_v46 }
 0x425   : > { %v1163_v32 = vpop.xlane.xlu1 %1162  ;;  %v1627_v15 = vpop.xlane.xlu2 %1626 }
 0x426   : > { %2195 = vrcp.f32 %v1163_v32  ;;  %v1175_v32 = vpop.xlane.xlu0 %1174 }
 0x427   : > { %2197 = vrcp.f32 %v1621_v13 }
 0x428   : > { %v1685_v62 = vpop.f32.mrf.mxu0  ;;  %2199 = vrcp.f32 %v1618_v58 }
 0x429   : > { %933 = vadd.xlane.f32.xlu0 %v932_v31  ;;  %2201 = vrcp.f32 %v1166_v30 }
 0x42c   : > { %v2196_v50 = vpop.eup %2195 }
 0x42d   : > { %v1252_v26 = vmul.f32 %v2196_v50, %v1228_v28  ;;  %v2198_v11 = vpop.eup %2197  ;;  %v1353_v61 = vpop.xlane.xlu2 %1352 }
 0x42e   : > { %v2200_v49 = vpop.eup %2199 }
 0x42f   : > { %v2085_v59 = vpack.i.bf16 %v1252_v26, %v1251_v55  ;;  %v1713_v29 = vmul.f32 %v2200_v49, %v1685_v62  ;;  %v2202_v27 = vpop.eup %2201  ;;  %v929_v26 = vsel %vm871_vm11, %v2879_v41, 0.0 }
 0x430   : > { %v1687_v54 = vpop.f32.mrf.mxu0  ;;  %v3178_v4 = vmul.f32 %v2202_v27, %v1231_v1 }
 0x431   : > { %v1714_v9 = vmul.f32 %v2198_v11, %v1687_v54  ;;  %2086 = vrot.lane.b32.xlu1 %v2085_v59, %s2285_s23  ;;  %1388 = vadd.xlane.f32.xlu0 %v1387_v36 }
 0x433   : > { %v2080_v3 = vpack.i.bf16 %v1714_v9, %v1713_v29 }
 0x435   : > { %2081 = vrot.lane.b32.xlu2 %v2080_v3, %s2286_s24 }
 0x43b   : > { %v1624_v7 = vpop.xlane.xlu1 %1623 }
 0x443   : > { %v1169_v17 = vpop.xlane.xlu1 %1168 }
 0x444   : > { %2203 = vrcp.f32 %v1169_v17 }
 0x445   : > { %2205 = vrcp.f32 %v1627_v15 }
 0x446   : > { %v1690_v34 = vpop.f32.mrf.mxu0  ;;  %v3174_v22 = vpop.xlane.xlu2 %1632  ;;  %2207 = vrcp.f32 %v1624_v7 }
 0x447   : > { %2209 = vrcp.f32 %v1175_v32 }
 0x448   : > { %2211 = vpow2.f32 %v1372_v20 }
 0x44a   : > { %v2204_v12 = vpop.eup %2203 }
 0x44b   : > { %v3176_v33 = vpop.xlane.xlu1 %1629  ;;  %v3180_v63 = vmul.f32 %v2204_v12, %v1233_v48  ;;  %v2206_v16 = vpop.eup %2205  ;;  %v1365_v48 = vsub.f32 %v3107_v24, %v1353_v61 }
 0x44c   : > { %v2208_v44 = vpop.eup %2207 }
 0x44d   : > { %v2105_v51 = vpack.i.bf16 %v3180_v63, %v3178_v4  ;;  %v1715_v28 = vmul.f32 %v2208_v44, %v1690_v34  ;;  %v1378_v56 = vmul.f32 1.442695, %v1365_v48  ;;  %v2210_v38 = vpop.eup %2209 }
 0x44e   : > { %v1692_v14 = vpop.f32.mrf.mxu0  ;;  %v1356_v10 = vpop.xlane.xlu2 %1355  ;;  %v3192_v59 = vmul.f32 %v2210_v38, %v3163_v53 }
 0x44f   : > { %v1716_v58 = vmul.f32 %v2206_v16, %v1692_v14  ;;  %v2212_v50 = vpop.eup %2211  ;;  %v1366_v17 = vsub.f32 %v3123_v60, %v1356_v10 }
 0x450   : > { %v1390_v16 = vsel %vm871_vm11, %v2212_v50, 0.0 }
 0x451   : > { %v2090_v46 = vpack.i.bf16 %v1716_v58, %v1715_v28 }
 0x453   : > { %v1347_v13 = vpop.xlane.xlu1 %1346  ;;  %2091 = vrot.lane.b32.xlu1 %v2090_v46, %s2286_s24 }
 0x454   : > { %v1363_v1 = vsub.f32 %v3134_v45, %v1347_v13 }
 0x456   : > { %v1374_v62 = vmul.f32 1.442695, %v1363_v1  ;;  %v1172_v31 = vpop.xlane.xlu2 %1171  ;;  %v1695_v14 = vpop.f32.mrf.mxu0 }
 0x457   : > { %2213 = vrcp.f32 %v1172_v31  ;;  %v938_v31 = vsel %vm871_vm11, %v2909_v25, 0.0 }
 0x458   : > { %2215 = vpow2.f32 %v1374_v62 }
 0x459   : > { %2217 = vpow2.f32 %v1378_v56 }
 0x45a   : > { %2219 = vrcp.f32 %v922_v42 }
 0x45b   : > { %v1350_v35 = vpop.xlane.xlu1 %1349 }
 0x45c   : > { %v1364_v24 = vsub.f32 %v3144_v5, %v1350_v35 }
 0x45d   : > { %v2214_v55 = vpop.eup %2213 }
 0x45e   : > { %v2216_v11 = vpop.eup %2215  ;;  %v3195_v45 = vmul.f32 %v2214_v55, %v3161_v43  ;;  %930 = vadd.xlane.f32.xlu2 %v929_v26  ;;  %v1376_v41 = vmul.f32 1.442695, %v1364_v24  ;;  %v1384_v43 = vsel %vm871_vm11, %v3149_v52, 0.0  ;;  %v1367_v52 = vsub.f32 %v3091_v47, %v3172_v2  ;;  %v1697_v2 = vpop.f32.mrf.mxu0 }
 0x45f   : > { %v1393_v49 = vsel %vm871_vm11, %v2216_v11, 0.0  ;;  %v1409_v54 = vpack.c.bf16 %v2216_v11, %v2212_v50  ;;  %v2218_v29 = vpop.eup %2217 }
 0x460   : > { %1394 = vadd.xlane.f32.xlu0 %v1393_v49  ;;  %v2120_v36 = vpack.i.bf16 %v3192_v59, %v3195_v45  ;;  %v2220_v5 = vpop.eup %2219  ;;  %v1399_v9 = vsel %vm871_vm11, %v2218_v29, 0.0  ;;  %v1382_v37 = vmul.f32 1.442695, %v1367_v52  ;;  %v2042_v59 = vld [vmem:[%s3322_s3] sm:$0xff] }
 0x461   : > { %2013 = vmatmul.msk.bf16.gmra.mxu1 %vm871_vm11, %v1409_v54  ;;  %v1017_v30 = vmul.f32 %v2220_v5, %v3116_v6  ;;  %v1380_v6 = vmul.f32 1.442695, %v1366_v17 }
 0x463   : > { %v925_v53 = vpop.xlane.xlu1 %924  ;;  %v1639_v56 = vpop.xlane.xlu2 %1638 }
 0x464   : > { %2221 = vrcp.f32 %v925_v53 }
 0x465   : > { %2223 = vpow2.f32 %v1376_v41 }
 0x466   : > { %1385 = vadd.xlane.f32.xlu2 %v1384_v43  ;;  %2225 = vpow2.f32 %v1380_v6  ;;  %v1453_v50 = vpop.f32.mrf.mxu1 }
 0x467   : > { %2227 = vpow2.f32 %v1382_v37 }
 0x468   : > { %1400 = vadd.xlane.f32.xlu0 %v1399_v9  ;;  %2229 = vrcp.f32 %v3174_v22 }
 0x469   : > { %v2077_v3 = vpop.permute.xlu0 %2076  ;;  %2231 = vrcp.f32 %v3176_v33 }
 0x46a   : > { %v2222_v15 = vpop.eup %2221  ;;  %v2079_v7 = vunpack.i.h.bf16 %v2077_v3  ;;  %v2078_v61 = vunpack.i.l.bf16 %v2077_v3 }
 0x46b   : > { %v1018_v34 = vmul.f32 %v2222_v15, %v3125_v0  ;;  %v2224_v27 = vpop.eup %2223  ;;  %v3229_v1 = vpop.xlane.xlu1 %1635 }
 0x46c   : > { %v3211_v42 = vsel %vm811_vm10, %v1017_v30, %v2078_v61  ;;  %v1410_v44 = vpack.c.bf16 %v2218_v29, %v2224_v27  ;;  %v1396_v60 = vsel %vm871_vm11, %v2224_v27, 0.0  ;;  %v2226_v47 = vpop.eup %2225 }
 0x46d   : > { %v3214_v12 = vsel %vm811_vm10, %v1018_v34, %v2079_v7  ;;  %v2228_v0 = vpop.eup %2227  ;;  %v1402_v10 = vsel %vm871_vm11, %v2226_v47, 0.0 }
 0x46e   : > { %1391 = vadd.xlane.f32.xlu2 %v1390_v16  ;;  %v2230_v28 = vpop.eup %2229  ;;  %v1405_v58 = vsel %vm871_vm11, %v2228_v0, 0.0  ;;  %v1411_v22 = vpack.c.bf16 %v2228_v0, %v2226_v47  ;;  %v1455_v11 = vpop.f32.mrf.mxu1  ;;  %v935_v0 = vsel %vm871_vm11, %v2894_v8, 0.0 }
 0x46f   : > { %v1718_v46 = vmul.f32 %v2230_v28, %v1697_v2  ;;  %v2232_v20 = vpop.eup %2231  ;;  %v2043_v2 = vld [vmem:[%s3322_s3 + $0x8] sm:$0xff]  ;;  %v941_v28 = vsel %vm871_vm11, %v2911_v19, 0.0 }
 0x470   : > { %v1717_v32 = vmul.f32 %v2232_v20, %v1695_v14  ;;  %1885 = vmatpush.bf16.msra.mxu2 %v2043_v2 }
 0x471   : > { %2014 = vmatmul.msk.bf16.gmra.mxu1 %vm871_vm11, %v1410_v44 }
 0x472   : > { %v2110_v33 = vpack.i.bf16 %v1718_v46, %v1717_v32 }
 0x474   : > { %1886 = vmatpush.bf16.msra.mxu2 %v2042_v59 }
 0x476   : > { %1397 = vadd.xlane.f32.xlu2 %v1396_v60 }
 0x47c   : > { %2106 = vrot.lane.b32.xlu0 %v2105_v51, %s2285_s23 }
 0x47d   : > { %1403 = vadd.xlane.f32.xlu1 %v1402_v10 }
 0x47e   : > { %1406 = vadd.xlane.f32.xlu2 %v1405_v58 }
 0x481   : > { %2015 = vmatmul.msk.bf16.gmra.mxu1 %vm871_vm11, %v1411_v22  ;;  %v1700_v22 = vpop.f32.mrf.mxu0 }
 0x484   : > { %2111 = vrot.lane.b32.xlu0 %v2110_v33, %s2286_s24 }
 0x48f   : > { %v3237_v38 = vpop.permute.xlu2 %2081 }
 0x494   : > { %v928_v13 = vpop.xlane.xlu0 %927 }
 0x495   : > { %2233 = vrcp.f32 %v928_v13 }
 0x49b   : > { %v2234_v4 = vpop.eup %2233 }
 0x49c   : > { %v1019_v51 = vmul.f32 %v2234_v4, %v2997_v21  ;;  %v3239_v35 = vpop.xlane.xlu0 %933 }
 0x4a3   : > { %v2087_v63 = vpop.permute.xlu1 %2086 }
 0x4a4   : > { %v2088_v48 = vunpack.i.l.bf16 %v2087_v63  ;;  %v1389_v26 = vpop.xlane.xlu0 %1388  ;;  %v2089_v21 = vunpack.i.h.bf16 %v2087_v63  ;;  %v1702_v63 = vpop.f32.mrf.mxu0 }
 0x4a6   : > { %v3233_v62 = vsel %vm811_vm10, %v1019_v51, %v2088_v48 }
 0x4ae   : > { %939 = vadd.xlane.f32.xlu0 %v938_v31 }
 0x4c5   : > { %v2092_v10 = vpop.permute.xlu1 %2091 }
 0x4d1   : > { %v931_v55 = vpop.xlane.xlu2 %930 }
 0x4d2   : > { %2235 = vrcp.f32 %v931_v55  ;;  %v2084_v55 = vunpack.i.h.bf16 %v3237_v38 }
 0x4d3   : > { %2237 = vrcp.f32 %v1389_v26  ;;  %v1395_v53 = vpop.xlane.xlu0 %1394  ;;  %v2083_v26 = vunpack.i.l.bf16 %v3237_v38  ;;  %v2093_v38 = vunpack.i.l.bf16 %v2092_v10 }
 0x4d8   : > { %v2236_v24 = vpop.eup %2235 }
 0x4d9   : > { %v1020_v49 = vmul.f32 %v2236_v24, %v3004_v18  ;;  %v1386_v54 = vpop.xlane.xlu2 %1385  ;;  %v2238_v41 = vpop.eup %2237 }
 0x4da   : > { %2239 = vrcp.f32 %v1386_v54  ;;  %v1482_v3 = vmul.f32 %v2238_v41, %v1455_v11 }
 0x4db   : > { %v3243_v25 = vsel %vm811_vm10, %v1020_v49, %v2089_v21  ;;  %2241 = vrcp.f32 %v1395_v53  ;;  %v1401_v52 = vpop.xlane.xlu0 %1400 }
 0x4de   : > { %v1458_v29 = vpop.f32.mrf.mxu1 }
 0x4e0   : > { %v2240_v43 = vpop.eup %2239 }
 0x4e1   : > { %v1392_v5 = vpop.xlane.xlu2 %1391  ;;  %v1481_v9 = vmul.f32 %v2240_v43, %v1453_v50  ;;  %v2242_v18 = vpop.eup %2241  ;;  %v2094_v43 = vunpack.i.h.bf16 %v2092_v10 }
 0x4e2   : > { %2243 = vrcp.f32 %v1392_v5 }
 0x4e3   : > { %v2095_v15 = vpack.i.bf16 %v1482_v3, %v1481_v9 }
 0x4e5   : > { %2096 = vrot.lane.b32.xlu1 %v2095_v15, %s2287_s25 }
 0x4e6   : > { %v1460_v30 = vpop.f32.mrf.mxu1 }
 0x4e7   : > { %v1484_v17 = vmul.f32 %v2242_v18, %v1460_v30 }
 0x4e8   : > { %v2244_v7 = vpop.eup %2243 }
 0x4e9   : > { %v1483_v61 = vmul.f32 %v2244_v7, %v1458_v29  ;;  %v1398_v27 = vpop.xlane.xlu2 %1397 }
 0x4ea   : > { %2245 = vrcp.f32 %v1398_v27 }
 0x4eb   : > { %v2100_v34 = vpack.i.bf16 %v1484_v17, %v1483_v61  ;;  %2247 = vrcp.f32 %v1401_v52 }
 0x4ed   : > { %2101 = vrot.lane.b32.xlu1 %v2100_v34, %s2287_s25 }
 0x4ee   : > { %v1463_v16 = vpop.f32.mrf.mxu1  ;;  %v2107_v15 = vpop.permute.xlu0 %2106 }
 0x4ef   : > { %v2108_v61 = vunpack.i.l.bf16 %v2107_v15  ;;  %v2109_v27 = vunpack.i.h.bf16 %v2107_v15 }
 0x4f0   : > { %v2246_v6 = vpop.eup %2245  ;;  %v1404_v20 = vpop.xlane.xlu1 %1403 }
 0x4f1   : > { %v2248_v44 = vpop.eup %2247  ;;  %v1485_v14 = vmul.f32 %v2246_v6, %v1463_v16  ;;  %v1407_v46 = vpop.xlane.xlu2 %1406 }
 0x4f2   : > { %2249 = vrcp.f32 %v1407_v46 }
 0x4f3   : > { %2251 = vrcp.f32 %v1404_v20 }
 0x4f4   : > { %2253 = vrcp.f32 %v1639_v56 }
 0x4f5   : > { %2255 = vrcp.f32 %v3229_v1 }
 0x4f6   : > { %v1465_v37 = vpop.f32.mrf.mxu1  ;;  %2257 = vrcp.f32 %v3239_v35 }
 0x4f7   : > { %v1486_v60 = vmul.f32 %v2248_v44, %v1465_v37 }
 0x4f8   : > { %v2250_v8 = vpop.eup %2249 }
 0x4f9   : > { %v2115_v47 = vpack.i.bf16 %v1486_v60, %v1485_v14  ;;  %v2252_v13 = vpop.eup %2251 }
 0x4fa   : > { %v2254_v51 = vpop.eup %2253 }
 0x4fb   : > { %2116 = vrot.lane.b32.xlu2 %v2115_v47, %s2287_s25  ;;  %v2256_v48 = vpop.eup %2255  ;;  %v1720_v31 = vmul.f32 %v2254_v51, %v1702_v63 }
 0x4fc   : > { %v1719_v50 = vmul.f32 %v2256_v48, %v1700_v22  ;;  %v2258_v7 = vpop.eup %2257 }
 0x4fe   : > { %v1468_v58 = vpop.f32.mrf.mxu1  ;;  %v2130_v45 = vpack.i.bf16 %v1720_v31, %v1719_v50 }
 0x4ff   : > { %v1487_v19 = vmul.f32 %v2252_v13, %v1468_v58 }
 0x506   : > { %v1470_v32 = vpop.f32.mrf.mxu1 }
 0x507   : > { %v1488_v33 = vmul.f32 %v2250_v8, %v1470_v32 }
 0x509   : > { %v2125_v4 = vpack.i.bf16 %v1488_v33, %v1487_v19 }
 0x517   : > { %936 = vadd.xlane.f32.xlu1 %v935_v0 }
 0x524   : > { %942 = vadd.xlane.f32.xlu2 %v941_v28 }
 0x530   : > { %2121 = vrot.lane.b32.xlu1 %v2120_v36, %s2285_s23 }
 0x538   : > { %2126 = vrot.lane.b32.xlu1 %v2125_v4, %s2287_s25 }
 0x540   : > { %2131 = vrot.lane.b32.xlu1 %v2130_v45, %s2286_s24 }
 0x555   : > { %v2117_v18 = vpop.permute.xlu2 %2116 }
 0x556   : > { %v2118_v17 = vunpack.i.l.bf16 %v2117_v18  ;;  %v2119_v6 = vunpack.i.h.bf16 %v2117_v18 }
 0x557   : > { %v2097_v36 = vpop.permute.xlu1 %2096 }
 0x558   : > { %v2099_v56 = vunpack.i.h.bf16 %v2097_v36  ;;  %v2098_v1 = vunpack.i.l.bf16 %v2097_v36 }
 0x55a   : > { %v1827_v11 = vsel %vm1825_vm12, %v3214_v12, %v2099_v56  ;;  %v1826_v24 = vsel %vm1825_vm12, %v3211_v42, %v2098_v1 }
 0x55b   : > { %v1835_v21 = vsel %vm1834_vm13, %v1826_v24, %v2083_v26  ;;  %v1836_v49 = vsel %vm1834_vm13, %v1827_v11, %v2084_v55 }
 0x55c   : > { %v1843_v54 = vpack.c.bf16 %v1836_v49, %v1835_v21 }
 0x55e   : > { %2032 = vmatmul.msk.bf16.vlgmr.msra.gmra.mxu2 %vm339_vm0, %v1843_v54 }
 0x55f   : > { %v2102_v41 = vpop.permute.xlu1 %2101 }
 0x560   : > { %v2104_v53 = vunpack.i.h.bf16 %v2102_v41  ;;  %v2103_v29 = vunpack.i.l.bf16 %v2102_v41 }
 0x562   : > { %v1829_v5 = vsel %vm1825_vm12, %v3243_v25, %v2104_v53  ;;  %v1828_v12 = vsel %vm1825_vm12, %v3233_v62, %v2103_v29  ;;  %v1021_v25 = vmul.f32 %v2258_v7, %v3006_v40  ;;  %v2112_v62 = vpop.permute.xlu0 %2111 }
 0x563   : > { %v1837_v42 = vsel %vm1834_vm13, %v1828_v12, %v2093_v38  ;;  %v1838_v9 = vsel %vm1834_vm13, %v1829_v5, %v2094_v43  ;;  %v2114_v35 = vunpack.i.h.bf16 %v2112_v62  ;;  %v2113_v37 = vunpack.i.l.bf16 %v2112_v62 }
 0x564   : > { %v1844_v3 = vpack.c.bf16 %v1838_v9, %v1837_v42  ;;  %v1821_v52 = vsel %vm811_vm10, %v1021_v25, %v2108_v61 }
 0x565   : > { %v1830_v44 = vsel %vm1825_vm12, %v1821_v52, %v2118_v17 }
 0x566   : > { %v1839_v47 = vsel %vm1834_vm13, %v1830_v44, %v2113_v37 }
 0x56a   : > { %v940_v10 = vpop.xlane.xlu0 %939 }
 0x56e   : > { %2033 = vmatmul.msk.bf16.gmra.mxu2 %vm339_vm0, %v1844_v3 }
 0x58a   : > { %v937_v30 = vpop.xlane.xlu1 %936 }
 0x58b   : > { %2259 = vrcp.f32 %v937_v30 }
 0x58c   : > { %2261 = vrcp.f32 %v940_v10 }
 0x591   : > { %v2260_v34 = vpop.eup %2259 }
 0x592   : > { %v1022_v16 = vmul.f32 %v2260_v34, %v3011_v57  ;;  %v2262_v58 = vpop.eup %2261 }
 0x593   : > { %v1023_v33 = vmul.f32 %v2262_v58, %v3021_v23  ;;  %v2136_v23 = vld [vmem:[%s3323_s4] ss:$0 sm:$0xff] }
 0x594   : > { %v1822_v14 = vsel %vm811_vm10, %v1022_v16, %v2109_v27 }
 0x595   : > { %v1831_v60 = vsel %vm1825_vm12, %v1822_v14, %v2119_v6 }
 0x596   : > { %v1840_v40 = vsel %vm1834_vm13, %v1831_v60, %v2114_v35 }
 0x597   : > { %v1845_v0 = vpack.c.bf16 %v1840_v40, %v1839_v47  ;;  %v943_v28 = vpop.xlane.xlu2 %942 }
 0x598   : > { %2263 = vrcp.f32 %v943_v28 }
 0x599   : > { %2034 = vmatmul.msk.bf16.gmra.mxu2 %vm339_vm0, %v1845_v0 }
 0x59e   : > { %v2264_v46 = vpop.eup %2263 }
 0x59f   : > { %v1024_v13 = vmul.f32 %v2264_v46, %v3030_v39 }
 0x5a2   : > { %v2122_v2 = vpop.permute.xlu1 %2121 }
 0x5a3   : > { %v2124_v20 = vunpack.i.h.bf16 %v2122_v2  ;;  %v2123_v22 = vunpack.i.l.bf16 %v2122_v2 }
 0x5a5   : > { %v1823_v4 = vsel %vm811_vm10, %v1023_v33, %v2123_v22  ;;  %v1824_v63 = vsel %vm811_vm10, %v1024_v13, %v2124_v20 }
 0x5aa   : > { %v2127_v57 = vpop.permute.xlu1 %2126 }
 0x5ab   : > { %v2129_v32 = vunpack.i.h.bf16 %v2127_v57  ;;  %v2128_v8 = vunpack.i.l.bf16 %v2127_v57 }
 0x5ad   : > { %v1832_v31 = vsel %vm1825_vm12, %v1823_v4, %v2128_v8  ;;  %v1833_v50 = vsel %vm1825_vm12, %v1824_v63, %v2129_v32 }
 0x5b2   : > { %v2132_v19 = vpop.permute.xlu1 %2131 }
 0x5b3   : > { %v2134_v51 = vunpack.i.h.bf16 %v2132_v19  ;;  %v2133_v48 = vunpack.i.l.bf16 %v2132_v19 }
 0x5b5   : > { %v1841_v59 = vsel %vm1834_vm13, %v1832_v31, %v2133_v48  ;;  %v1842_v45 = vsel %vm1834_vm13, %v1833_v50, %v2134_v51 }
 0x5b6   : > { %v1846_v36 = vpack.c.bf16 %v1842_v45, %v1841_v59 }
 0x5b8   : > { %2035 = vmatmul.msk.bf16.gmra.mxu2 %vm339_vm0, %v1846_v36 }
 0x5e1   : > { %v1888_v39 = vpop.f32.mrf.mxu2 }
 0x5e2   : > { %v1889_v56 = vadd.f32 %v2136_v23, %v1888_v39 }
 0x5e4   : > { %1908 = vst.msk [vmem:[%s305_s11] sm:$0xff] %vm339_vm0, %v1889_v56 }
 0x5e9   : > { %v1890_v1 = vpop.f32.mrf.mxu2 }
 0x5ea   : > { %v1891_v55 = vadd.f32 %v2136_v23, %v1890_v1 }
 0x5ec   : > { %1909 = vst.msk [vmem:[%s305_s11 + $0x8] sm:$0xff] %vm339_vm0, %v1891_v55 }
 0x5f1   : > { %v1893_v26 = vpop.f32.mrf.mxu2 }
 0x5f2   : > { %v1894_v11 = vadd.f32 %v2136_v23, %v1893_v26 }
 0x5f4   : > { %1910 = vst.msk [vmem:[%s305_s11 + $0x10] sm:$0xff] %vm339_vm0, %v1894_v11 }
 0x5f9   : > { %v1895_v24 = vpop.f32.mrf.mxu2 }
 0x5fa   : > { %v1896_v21 = vadd.f32 %v2136_v23, %v1895_v24 }
 0x5fc   : > { %1911 = vst.msk [vmem:[%s305_s11 + $0x18] sm:$0xff] %vm339_vm0, %v1896_v21 }
 0x61c   : > { %v1898_v49 = vpop.f32.mrf.mxu2 }
 0x61d   : > { %v1899_v54 = vadd.f32 %v2136_v23, %v1898_v49 }
 0x61f   : > { %1912 = vst.msk [vmem:[%s305_s11 + $0x20] sm:$0xff] %vm339_vm0, %v1899_v54 }
 0x624   : > { %v1900_v41 = vpop.f32.mrf.mxu2 }
 0x625   : > { %v1901_v53 = vadd.f32 %v2136_v23, %v1900_v41 }
 0x627   : > { %1913 = vst.msk [vmem:[%s305_s11 + $0x28] sm:$0xff] %vm339_vm0, %v1901_v53 }
 0x63b   : > { %v1903_v29 = vpop.f32.mrf.mxu2 }
 0x63c   : > { %v1904_v43 = vadd.f32 %v2136_v23, %v1903_v29 }
 0x63e   : > { %1914 = vst.msk [vmem:[%s305_s11 + $0x30] sm:$0xff] %vm339_vm0, %v1904_v43 }
 0x643   : > { %v1905_v38 = vpop.f32.mrf.mxu2 }
 0x644   : > { %v1906_v5 = vadd.f32 %v2136_v23, %v1905_v38 }
 0x646   : > { %1915 = vst.msk [vmem:[%s305_s11 + $0x38] sm:$0xff] %vm339_vm0, %v1906_v5 }
 0x647 PF: > { %s18_s27 = sadd.s32 1, %s2271_s27  }
 0x648   : > { %p15_p4 = scmp.ge.s32.totalorder %s18_s27, 4  }
 0x64a   :  { %17 = sbr.rel (!%p15_p4) target bundleno = 1 (0x1), region = 82 }

</bundles_post_ra>
